<compile_context>
chip_gen: v7x
topology: tpu7x:2x2x1
jax: 0.10.0
libtpu: 0.0.40
codegen_flags: <defaults>
</compile_context>

<pallas_src>
import numpy as np
import jax
import jax.numpy as jnp
from jax.experimental import pallas as pl
from jax.experimental.pallas import tpu as pltpu

EPS = 1e-5


def _round_up(a, b):
    return (a + b - 1) // b * b


def _interior_mask(width, core_off, n, h, w):
    """mask[0, j] = 1.0 iff column j maps to a real (non-halo, non-guard) output pixel."""
    ph, pw = h + 2, w + 2
    j = np.arange(width)
    q = j - core_off
    valid = (q >= 0) & (q < n * ph * pw)
    qc = np.where(valid, q, 0)
    hp = (qc % (ph * pw)) // pw
    wp = qc % pw
    inside = valid & (hp >= 1) & (hp <= h) & (wp >= 1) & (wp <= w)
    return jnp.asarray(inside.astype(np.float32)[None, :])


def resnet_basic_block(x_nchw, params):
    """x_nchw: (N, C, H, W) float32 (PyTorch layout). Returns (N, C, H, W)."""
    w1, b1, g1, be1, w2, b2, g2, be2 = params
    N, C, H, W = x_nchw.shape
    # The PyTorch module's residual add only type-checks for stride=1 and Cin == Cout.
    assert w1.shape == (C, C, 3, 3) and w2.shape == (C, C, 3, 3), "need stride=1, Cin==Cout"

    PH, PW = H + 2, W + 2
    Q = N * PH * PW                 # flattened padded spatial grid size
    HALO = PW + 1                   # max |lane offset| of a 3x3 tap
    NPIX = float(N * H * W)         # BN population size per channel

    # Lane-buffer geometry: [zeros | core | zeros]; core offsets chosen so every 3x3 tap
    # is an in-bounds *static* lane slice (no rolls, no wrap handling).
    B_OFF = HALO                                        # core offset in conv1 output slab
    L2 = _round_up(Q, 128)                              # output slab width (lane-dense)
    L1 = _round_up(B_OFF + HALO + L2, 128)              # conv1/bn1/relu slab width
    A_OFF = B_OFF + HALO                                # core offset in input slab
    L0 = _round_up(A_OFF - B_OFF + HALO + L1, 128)      # input slab width

    # Tap lane offsets, ordered (dy, dx) to match the weight reshape below.
    offs = [(dy - 1) * PW + (dx - 1) for dy in range(3) for dx in range(3)]

    # ---- wrapper-side layout plumbing (pure JAX, compile-time constants for masks) ----
    xpad = jnp.pad(x_nchw.astype(jnp.float32), ((0, 0), (0, 0), (1, 1), (1, 1)))
    x_cm = jnp.transpose(xpad, (1, 0, 2, 3)).reshape(C, Q)          # channel-major slab
    x_buf = jnp.pad(x_cm, ((0, 0), (A_OFF, L0 - A_OFF - Q)))        # (C, L0) f32

    mask1 = _interior_mask(L1, B_OFF, N, H, W)                      # (1, L1)
    mask2 = _interior_mask(L2, 0, N, H, W)                          # (1, L2)

    # (Cout, Cin, 3, 3) -> (Cout, 3, 3, Cin) -> (Cout, 9*Cin); row order matches `offs`.
    # Weights go to bf16 (MXU-native); accumulation stays f32.
    w1r = jnp.transpose(w1, (0, 2, 3, 1)).reshape(C, 9 * C).astype(jnp.bfloat16)
    w2r = jnp.transpose(w2, (0, 2, 3, 1)).reshape(C, 9 * C).astype(jnp.bfloat16)
    # Conv biases are NOT passed in: under training-mode BatchNorm the mean subtraction
    # cancels any per-channel constant exactly.
    del b1, b2
    g1c = g1.reshape(C, 1).astype(jnp.float32)
    be1c = be1.reshape(C, 1).astype(jnp.float32)
    g2c = g2.reshape(C, 1).astype(jnp.float32)
    be2c = be2.reshape(C, 1).astype(jnp.float32)

    def kernel(x_ref, m1_ref, m2_ref, w1_ref, g1_ref, be1_ref,
               w2_ref, g2_ref, be2_ref, o_ref, xb_ref, yr_ref):
        m1 = m1_ref[...]                                            # (1, L1)
        m2 = m2_ref[...]                                            # (1, L2)

        # One cast of the input slab into bf16 scratch so the 9 conv1 taps are bf16
        # ref-sliced loads (residual add below still reads the f32 x_ref).
        xb_ref[...] = x_ref[...].astype(jnp.bfloat16)               # (C, L0) bf16

        # conv1: single im2col matmul, K = 9*C, bf16 operands, f32 accumulate.
        p1 = jnp.concatenate(
            [xb_ref[:, A_OFF - B_OFF + o: A_OFF - B_OFF + o + L1] for o in offs], axis=0)
        y = jnp.dot(w1_ref[...], p1, preferred_element_type=jnp.float32)    # (C, L1) f32

        # bn1 (training mode): masked mean, then centered (two-pass) variance.
        mean1 = jnp.sum(y * m1, axis=1, keepdims=True) * (1.0 / NPIX)
        d1 = (y - mean1) * m1
        var1 = jnp.sum(d1 * d1, axis=1, keepdims=True) * (1.0 / NPIX)
        yn = d1 * jax.lax.rsqrt(var1 + EPS) * g1_ref[...] + be1_ref[...]
        # relu, then re-zero halo/guard columns so conv2 sees a correctly zero-padded
        # input; stored bf16 so conv2's taps are bf16 ref-sliced loads.
        yr_ref[...] = (jnp.maximum(yn, 0.0) * m1).astype(jnp.bfloat16)      # (C, L1) bf16

        # conv2: same single-matmul im2col, taps are static lane slices of the scratch.
        p2 = jnp.concatenate(
            [yr_ref[:, B_OFF + o: B_OFF + o + L2] for o in offs], axis=0)
        z = jnp.dot(w2_ref[...], p2, preferred_element_type=jnp.float32)    # (C, L2) f32

        # bn2 (training mode).
        mean2 = jnp.sum(z * m2, axis=1, keepdims=True) * (1.0 / NPIX)
        d2 = (z - mean2) * m2
        var2 = jnp.sum(d2 * d2, axis=1, keepdims=True) * (1.0 / NPIX)
        zn = d2 * jax.lax.rsqrt(var2 + EPS) * g2_ref[...] + be2_ref[...]

        # residual add (core slice of the same f32 input slab) + relu; lane-dense store
        # (L2 is a multiple of 128 -> unmasked vst on every vreg).
        o_ref[...] = jnp.maximum(x_ref[:, A_OFF: A_OFF + L2] + zn, 0.0)

    vmem = pl.BlockSpec(memory_space=pltpu.MemorySpace.VMEM)
    out_cm = pl.pallas_call(
        kernel,
        out_shape=jax.ShapeDtypeStruct((C, L2), jnp.float32),
        in_specs=[vmem] * 9,
        out_specs=vmem,
        scratch_shapes=[pltpu.VMEM((C, L0), jnp.bfloat16),   # bf16 copy of input slab
                        pltpu.VMEM((C, L1), jnp.bfloat16)],  # conv1/bn1/relu output slab
    )(x_buf, mask1, mask2, w1r, g1c, be1c, w2r, g2c, be2c)

    # (C, L2) slab -> drop guard columns -> (N, C, H, W)
    out = out_cm[:, :Q].reshape(C, N, PH, PW)[:, :, 1:H + 1, 1:W + 1]
    return jnp.transpose(out, (1, 0, 2, 3))


def reference(x_nchw, params):
    """Pure-JAX reference matching the PyTorch forward (training-mode BN, with conv bias)."""
    w1, b1, g1, be1, w2, b2, g2, be2 = params

    def conv(x, w, b):
        y = jax.lax.conv_general_dilated(x, w, (1, 1), ((1, 1), (1, 1)),
                                         dimension_numbers=('NCHW', 'OIHW', 'NCHW'))
        return y + b[None, :, None, None]

    def bn(x, g, be):
        mean = jnp.mean(x, axis=(0, 2, 3), keepdims=True)
        var = jnp.mean((x - mean) ** 2, axis=(0, 2, 3), keepdims=True)
        return ((x - mean) * jax.lax.rsqrt(var + EPS)
                * g[None, :, None, None] + be[None, :, None, None])

    y = jax.nn.relu(bn(conv(x_nchw, w1, b1), g1, be1))
    z = bn(conv(y, w2, b2), g2, be2)
    return jax.nn.relu(x_nchw + z)


if __name__ == "__main__":
    N, C, H, W = 2, 8, 16, 16  # in_channels == out_channels, stride = 1

    key = jax.random.PRNGKey(0)
    k_x, k_w1, k_b1, k_w2, k_b2 = jax.random.split(key, 5)

    x = jax.random.normal(k_x, (N, C, H, W), jnp.float32)

    fan_in = C * 3 * 3
    scale = 1.0 / jnp.sqrt(fan_in)
    w1 = jax.random.uniform(k_w1, (C, C, 3, 3), jnp.float32, -scale, scale)
    b1 = jax.random.uniform(k_b1, (C,), jnp.float32, -scale, scale)
    w2 = jax.random.uniform(k_w2, (C, C, 3, 3), jnp.float32, -scale, scale)
    b2 = jax.random.uniform(k_b2, (C,), jnp.float32, -scale, scale)
    g1 = jnp.ones((C,), jnp.float32)
    be1 = jnp.zeros((C,), jnp.float32)
    g2 = jnp.ones((C,), jnp.float32)
    be2 = jnp.zeros((C,), jnp.float32)

    params = (w1, b1, g1, be1, w2, b2, g2, be2)

    out = jax.block_until_ready(resnet_basic_block(x, params))
    ref = jax.block_until_ready(reference(x, params))

    assert out.shape == (N, C, H, W)
    # bf16 matmul operands (f32 accumulation) vs the all-f32 reference -> looser tolerance.
    assert jnp.allclose(out, ref, atol=3e-2, rtol=3e-2), (
        float(jnp.max(jnp.abs(out - ref))))

    print("KERNEL_OK")
</pallas_src>

<mosaic_0001>
module attributes {stable_mosaic.version = 11 : i64} {
  func.func @kernel(%arg0: memref<8x1024xf32, #tpu.memory_space<vmem>>, %arg1: memref<1x896xf32, #tpu.memory_space<vmem>>, %arg2: memref<1x768xf32, #tpu.memory_space<vmem>>, %arg3: memref<8x72xbf16, #tpu.memory_space<vmem>>, %arg4: memref<8x1xf32, #tpu.memory_space<vmem>>, %arg5: memref<8x1xf32, #tpu.memory_space<vmem>>, %arg6: memref<8x72xbf16, #tpu.memory_space<vmem>>, %arg7: memref<8x1xf32, #tpu.memory_space<vmem>>, %arg8: memref<8x1xf32, #tpu.memory_space<vmem>>, %arg9: memref<8x768xf32, #tpu.memory_space<vmem>>, %arg10: memref<8x1024xbf16, #tpu.memory_space<vmem>>, %arg11: memref<8x896xbf16, #tpu.memory_space<vmem>>) attributes {dimension_semantics = [], scalar_prefetch = 0 : i64, scratch_operands = 2 : i64, tpu.core_type = #tpu.core_type<tc>} {
    %c0 = arith.constant 0 : index
    %c0_0 = arith.constant 0 : index
    %0 = vector.load %arg1[%c0, %c0_0] : memref<1x896xf32, #tpu.memory_space<vmem>>, vector<1x896xf32>
    %c0_1 = arith.constant 0 : index
    %c0_2 = arith.constant 0 : index
    %1 = vector.load %arg2[%c0_1, %c0_2] : memref<1x768xf32, #tpu.memory_space<vmem>>, vector<1x768xf32>
    %c0_3 = arith.constant 0 : index
    %c0_4 = arith.constant 0 : index
    %2 = vector.load %arg0[%c0_3, %c0_4] : memref<8x1024xf32, #tpu.memory_space<vmem>>, vector<8x1024xf32>
    %3 = arith.truncf %2 : vector<8x1024xf32> to vector<8x1024xbf16>
    %c0_5 = arith.constant 0 : index
    %c0_6 = arith.constant 0 : index
    %4 = vector.load %arg10[%c0_5, %c0_6] : memref<8x1024xbf16, #tpu.memory_space<vmem>>, vector<8x1024xbf16>
    tpu.vector_store %arg10[%c0_5, %c0_6], %3 {strides = array<i32>} : memref<8x1024xbf16, #tpu.memory_space<vmem>>, vector<8x1024xbf16>,
    %c0_7 = arith.constant 0 : index
    %c0_8 = arith.constant 0 : index
    %5 = vector.load %arg10[%c0_7, %c0_8] : memref<8x1024xbf16, #tpu.memory_space<vmem>>, vector<8x896xbf16>
    %c0_9 = arith.constant 0 : index
    %c1 = arith.constant 1 : index
    %6 = vector.load %arg10[%c0_9, %c1] : memref<8x1024xbf16, #tpu.memory_space<vmem>>, vector<8x896xbf16>
    %c0_10 = arith.constant 0 : index
    %c2 = arith.constant 2 : index
    %7 = vector.load %arg10[%c0_10, %c2] : memref<8x1024xbf16, #tpu.memory_space<vmem>>, vector<8x896xbf16>
    %c0_11 = arith.constant 0 : index
    %c18 = arith.constant 18 : index
    %8 = vector.load %arg10[%c0_11, %c18] : memref<8x1024xbf16, #tpu.memory_space<vmem>>, vector<8x896xbf16>
    %c0_12 = arith.constant 0 : index
    %c19 = arith.constant 19 : index
    %9 = vector.load %arg10[%c0_12, %c19] : memref<8x1024xbf16, #tpu.memory_space<vmem>>, vector<8x896xbf16>
    %c0_13 = arith.constant 0 : index
    %c20 = arith.constant 20 : index
    %10 = vector.load %arg10[%c0_13, %c20] : memref<8x1024xbf16, #tpu.memory_space<vmem>>, vector<8x896xbf16>
    %c0_14 = arith.constant 0 : index
    %c36 = arith.constant 36 : index
    %11 = vector.load %arg10[%c0_14, %c36] : memref<8x1024xbf16, #tpu.memory_space<vmem>>, vector<8x896xbf16>
    %c0_15 = arith.constant 0 : index
    %c37 = arith.constant 37 : index
    %12 = vector.load %arg10[%c0_15, %c37] : memref<8x1024xbf16, #tpu.memory_space<vmem>>, vector<8x896xbf16>
    %c0_16 = arith.constant 0 : index
    %c38 = arith.constant 38 : index
    %13 = vector.load %arg10[%c0_16, %c38] : memref<8x1024xbf16, #tpu.memory_space<vmem>>, vector<8x896xbf16>
    %14 = tpu.concatenate %5, %6, %7, %8, %9, %10, %11, %12, %13 in 0 : vector<8x896xbf16>, vector<8x896xbf16>, vector<8x896xbf16>, vector<8x896xbf16>, vector<8x896xbf16>, vector<8x896xbf16>, vector<8x896xbf16>, vector<8x896xbf16>, vector<8x896xbf16> -> vector<72x896xbf16>
    %c0_17 = arith.constant 0 : index
    %c0_18 = arith.constant 0 : index
    %15 = vector.load %arg3[%c0_17, %c0_18] : memref<8x72xbf16, #tpu.memory_space<vmem>>, vector<8x72xbf16>
    %cst = arith.constant dense<0.000000e+00> : vector<8x896xf32>
    %16 = tpu.matmul %15, %14, %cst {dimension_numbers = #tpu.dot_dimension_numbers<[1], [0], [0], [1], [0, 0, 1, 1], [], []>} : vector<8x72xbf16>, vector<72x896xbf16>, vector<8x896xf32> -> vector<8x896xf32>
    %17 = vector.broadcast %0 : vector<1x896xf32> to vector<8x896xf32>
    %18 = arith.mulf %16, %17 : vector<8x896xf32>
    %cst_19 = arith.constant dense<0.000000e+00> : vector<8xf32>
    %19 = vector.multi_reduction <add>, %18, %cst_19 [1] : vector<8x896xf32> to vector<8xf32>
    %20 = vector.shape_cast %19 : vector<8xf32> to vector<8x1xf32>
    %cst_20 = arith.constant 0.001953125 : f32
    %21 = vector.broadcast %cst_20 : f32 to vector<8x1xf32>
    %22 = arith.mulf %20, %21 : vector<8x1xf32>
    %23 = vector.broadcast %22 : vector<8x1xf32> to vector<8x896xf32>
    %24 = arith.subf %16, %23 : vector<8x896xf32>
    %25 = vector.broadcast %0 : vector<1x896xf32> to vector<8x896xf32>
    %26 = arith.mulf %24, %25 : vector<8x896xf32>
    %27 = arith.mulf %26, %26 : vector<8x896xf32>
    %cst_21 = arith.constant dense<0.000000e+00> : vector<8xf32>
    %28 = vector.multi_reduction <add>, %27, %cst_21 [1] : vector<8x896xf32> to vector<8xf32>
    %29 = vector.shape_cast %28 : vector<8xf32> to vector<8x1xf32>
    %cst_22 = arith.constant 0.001953125 : f32
    %30 = vector.broadcast %cst_22 : f32 to vector<8x1xf32>
    %31 = arith.mulf %29, %30 : vector<8x1xf32>
    %cst_23 = arith.constant 9.99999974E-6 : f32
    %32 = vector.broadcast %cst_23 : f32 to vector<8x1xf32>
    %33 = arith.addf %31, %32 : vector<8x1xf32>
    %34 = math.rsqrt %33 : vector<8x1xf32>
    %35 = vector.broadcast %34 : vector<8x1xf32> to vector<8x896xf32>
    %36 = arith.mulf %26, %35 : vector<8x896xf32>
    %c0_24 = arith.constant 0 : index
    %c0_25 = arith.constant 0 : index
    %37 = vector.load %arg4[%c0_24, %c0_25] : memref<8x1xf32, #tpu.memory_space<vmem>>, vector<8x1xf32>
    %38 = vector.broadcast %37 : vector<8x1xf32> to vector<8x896xf32>
    %39 = arith.mulf %36, %38 : vector<8x896xf32>
    %c0_26 = arith.constant 0 : index
    %c0_27 = arith.constant 0 : index
    %40 = vector.load %arg5[%c0_26, %c0_27] : memref<8x1xf32, #tpu.memory_space<vmem>>, vector<8x1xf32>
    %41 = vector.broadcast %40 : vector<8x1xf32> to vector<8x896xf32>
    %42 = arith.addf %39, %41 : vector<8x896xf32>
    %cst_28 = arith.constant 0.000000e+00 : f32
    %43 = vector.broadcast %cst_28 : f32 to vector<8x896xf32>
    %44 = arith.maximumf %42, %43 : vector<8x896xf32>
    %45 = vector.broadcast %0 : vector<1x896xf32> to vector<8x896xf32>
    %46 = arith.mulf %44, %45 : vector<8x896xf32>
    %47 = arith.truncf %46 : vector<8x896xf32> to vector<8x896xbf16>
    %c0_29 = arith.constant 0 : index
    %c0_30 = arith.constant 0 : index
    %48 = vector.load %arg11[%c0_29, %c0_30] : memref<8x896xbf16, #tpu.memory_space<vmem>>, vector<8x896xbf16>
    tpu.vector_store %arg11[%c0_29, %c0_30], %47 {strides = array<i32>} : memref<8x896xbf16, #tpu.memory_space<vmem>>, vector<8x896xbf16>,
    %c0_31 = arith.constant 0 : index
    %c0_32 = arith.constant 0 : index
    %49 = vector.load %arg11[%c0_31, %c0_32] : memref<8x896xbf16, #tpu.memory_space<vmem>>, vector<8x768xbf16>
    %c0_33 = arith.constant 0 : index
    %c1_34 = arith.constant 1 : index
    %50 = vector.load %arg11[%c0_33, %c1_34] : memref<8x896xbf16, #tpu.memory_space<vmem>>, vector<8x768xbf16>
    %c0_35 = arith.constant 0 : index
    %c2_36 = arith.constant 2 : index
    %51 = vector.load %arg11[%c0_35, %c2_36] : memref<8x896xbf16, #tpu.memory_space<vmem>>, vector<8x768xbf16>
    %c0_37 = arith.constant 0 : index
    %c18_38 = arith.constant 18 : index
    %52 = vector.load %arg11[%c0_37, %c18_38] : memref<8x896xbf16, #tpu.memory_space<vmem>>, vector<8x768xbf16>
    %c0_39 = arith.constant 0 : index
    %c19_40 = arith.constant 19 : index
    %53 = vector.load %arg11[%c0_39, %c19_40] : memref<8x896xbf16, #tpu.memory_space<vmem>>, vector<8x768xbf16>
    %c0_41 = arith.constant 0 : index
    %c20_42 = arith.constant 20 : index
    %54 = vector.load %arg11[%c0_41, %c20_42] : memref<8x896xbf16, #tpu.memory_space<vmem>>, vector<8x768xbf16>
    %c0_43 = arith.constant 0 : index
    %c36_44 = arith.constant 36 : index
    %55 = vector.load %arg11[%c0_43, %c36_44] : memref<8x896xbf16, #tpu.memory_space<vmem>>, vector<8x768xbf16>
    %c0_45 = arith.constant 0 : index
    %c37_46 = arith.constant 37 : index
    %56 = vector.load %arg11[%c0_45, %c37_46] : memref<8x896xbf16, #tpu.memory_space<vmem>>, vector<8x768xbf16>
    %c0_47 = arith.constant 0 : index
    %c38_48 = arith.constant 38 : index
    %57 = vector.load %arg11[%c0_47, %c38_48] : memref<8x896xbf16, #tpu.memory_space<vmem>>, vector<8x768xbf16>
    %58 = tpu.concatenate %49, %50, %51, %52, %53, %54, %55, %56, %57 in 0 : vector<8x768xbf16>, vector<8x768xbf16>, vector<8x768xbf16>, vector<8x768xbf16>, vector<8x768xbf16>, vector<8x768xbf16>, vector<8x768xbf16>, vector<8x768xbf16>, vector<8x768xbf16> -> vector<72x768xbf16>
    %c0_49 = arith.constant 0 : index
    %c0_50 = arith.constant 0 : index
    %59 = vector.load %arg6[%c0_49, %c0_50] : memref<8x72xbf16, #tpu.memory_space<vmem>>, vector<8x72xbf16>
    %cst_51 = arith.constant dense<0.000000e+00> : vector<8x768xf32>
    %60 = tpu.matmul %59, %58, %cst_51 {dimension_numbers = #tpu.dot_dimension_numbers<[1], [0], [0], [1], [0, 0, 1, 1], [], []>} : vector<8x72xbf16>, vector<72x768xbf16>, vector<8x768xf32> -> vector<8x768xf32>
    %61 = vector.broadcast %1 : vector<1x768xf32> to vector<8x768xf32>
    %62 = arith.mulf %60, %61 : vector<8x768xf32>
    %cst_52 = arith.constant dense<0.000000e+00> : vector<8xf32>
    %63 = vector.multi_reduction <add>, %62, %cst_52 [1] : vector<8x768xf32> to vector<8xf32>
    %64 = vector.shape_cast %63 : vector<8xf32> to vector<8x1xf32>
    %cst_53 = arith.constant 0.001953125 : f32
    %65 = vector.broadcast %cst_53 : f32 to vector<8x1xf32>
    %66 = arith.mulf %64, %65 : vector<8x1xf32>
    %67 = vector.broadcast %66 : vector<8x1xf32> to vector<8x768xf32>
    %68 = arith.subf %60, %67 : vector<8x768xf32>
    %69 = vector.broadcast %1 : vector<1x768xf32> to vector<8x768xf32>
    %70 = arith.mulf %68, %69 : vector<8x768xf32>
    %71 = arith.mulf %70, %70 : vector<8x768xf32>
    %cst_54 = arith.constant dense<0.000000e+00> : vector<8xf32>
    %72 = vector.multi_reduction <add>, %71, %cst_54 [1] : vector<8x768xf32> to vector<8xf32>
    %73 = vector.shape_cast %72 : vector<8xf32> to vector<8x1xf32>
    %cst_55 = arith.constant 0.001953125 : f32
    %74 = vector.broadcast %cst_55 : f32 to vector<8x1xf32>
    %75 = arith.mulf %73, %74 : vector<8x1xf32>
    %cst_56 = arith.constant 9.99999974E-6 : f32
    %76 = vector.broadcast %cst_56 : f32 to vector<8x1xf32>
    %77 = arith.addf %75, %76 : vector<8x1xf32>
    %78 = math.rsqrt %77 : vector<8x1xf32>
    %79 = vector.broadcast %78 : vector<8x1xf32> to vector<8x768xf32>
    %80 = arith.mulf %70, %79 : vector<8x768xf32>
    %c0_57 = arith.constant 0 : index
    %c0_58 = arith.constant 0 : index
    %81 = vector.load %arg7[%c0_57, %c0_58] : memref<8x1xf32, #tpu.memory_space<vmem>>, vector<8x1xf32>
    %82 = vector.broadcast %81 : vector<8x1xf32> to vector<8x768xf32>
    %83 = arith.mulf %80, %82 : vector<8x768xf32>
    %c0_59 = arith.constant 0 : index
    %c0_60 = arith.constant 0 : index
    %84 = vector.load %arg8[%c0_59, %c0_60] : memref<8x1xf32, #tpu.memory_space<vmem>>, vector<8x1xf32>
    %85 = vector.broadcast %84 : vector<8x1xf32> to vector<8x768xf32>
    %86 = arith.addf %83, %85 : vector<8x768xf32>
    %c0_61 = arith.constant 0 : index
    %c38_62 = arith.constant 38 : index
    %87 = vector.load %arg0[%c0_61, %c38_62] : memref<8x1024xf32, #tpu.memory_space<vmem>>, vector<8x768xf32>
    %88 = arith.addf %87, %86 : vector<8x768xf32>
    %cst_63 = arith.constant 0.000000e+00 : f32
    %89 = vector.broadcast %cst_63 : f32 to vector<8x768xf32>
    %90 = arith.maximumf %88, %89 : vector<8x768xf32>
    %c0_64 = arith.constant 0 : index
    %c0_65 = arith.constant 0 : index
    %91 = vector.load %arg9[%c0_64, %c0_65] : memref<8x768xf32, #tpu.memory_space<vmem>>, vector<8x768xf32>
    tpu.vector_store %arg9[%c0_64, %c0_65], %90 {strides = array<i32>} : memref<8x768xf32, #tpu.memory_space<vmem>>, vector<8x768xf32>,
    return
  }
}

</mosaic_0001>

<bundles_post_ra>
// kernel: tpu_custom_call.1
= control target key start
LH: loop header
LB: loop body
LE: loop exit
PB: predicated region body
PF: predicated region fallthrough
CT: control target
= control target key end

     0   :  { %14 = vsyncpa [#allocation5], 0  ;;  %s2324_s0 = inlined_call_operand.hbm [shape: f32[8,1024], index: 0, kind: input, shape index: {}]   ;;  %s2325_s1 = inlined_call_operand.vmem [shape: f32[1,896], index: 1, kind: input, shape index: {}]   ;;  %s2326_s2 = inlined_call_operand.vmem [shape: f32[1,768], index: 2, kind: input, shape index: {}]   ;;  %s2327_s3 = inlined_call_operand.vmem [shape: bf16[8,72], index: 3, kind: input, shape index: {}]   ;;  %s2328_s4 = inlined_call_operand.vmem [shape: f32[8,1], index: 4, kind: input, shape index: {}]   ;;  %s2329_s5 = inlined_call_operand.vmem [shape: f32[8,1], index: 5, kind: input, shape index: {}]   ;;  %s2330_s6 = inlined_call_operand.vmem [shape: bf16[8,72], index: 6, kind: input, shape index: {}]   ;;  %s2331_s7 = inlined_call_operand.vmem [shape: f32[8,1], index: 7, kind: input, shape index: {}]   ;;  %s2332_s8 = inlined_call_operand.vmem [shape: f32[8,1], index: 8, kind: input, shape index: {}]   ;;  %s2333_s9 = inlined_call_operand.hbm [shape: f32[8,768], index: 9, kind: output, shape index: {}]  }
   0x1   :  { %15 = vsyncpa [#allocation6], 0  ;;  %s1608_s30 = smov [#allocation4]   ;;  %s1560_s13 = scalar_lea.hbm %s2324_s0, 1024 }
   0x2   :  { %s22_s10 = sshll.u32 %s1608_s30, 4  ;;  %p1561_p0 = scmp.ne.s32.totalorder %s2324_s0, %s1560_s13  ;;  %s23_s10 = int_to_ptr.vmem [resolvable:$true] %s22_s10 }
   0x3   :  { %p1564_p1 = scmp.lt.u32.totalorder %s1560_s13, %s2324_s0 }
   0x5   :  { %p1566_p2 = pnand %p1564_p1, %p1561_p0 }
   0x7   :  { %1569 = shalt.err (!%p1566_p2)
}
   0x8   :  { %s1570_s18 = scalar_lea.vmem %s23_s10, 1024  ;;  %p1575_p4 = scmp.lt.s32.totalorder %s23_s10, %s23_s10 }
   0x9   :  { %p1571_p3 = scmp.ne.s32.totalorder %s23_s10, %s1570_s18  ;;  %p1576_p5 = scmp.lt.s32.totalorder %s1570_s18, %s1570_s18 }
   0xb   :  { %p1577_p6 = por %p1576_p5, %p1575_p4 }
   0xd   :  { %p1578_p7 = pnand %p1577_p6, %p1571_p3 }
   0xf   :  { %1581 = shalt.err (!%p1578_p7)
}
  0x10   :  { %25 = dma.hbm_to_vmem [thread:$0]  %s2324_s0, 1024, %s23_s10, [#allocation5]  }
  0x11   :  { %1604 = dma.done.wait [#allocation5], 1024  }
  0x12   :  { %1605 = vsyncadd [#allocation5], 4294966272  ;;  %v48_v0 = vld [vmem:[#allocation4] sm:$0xff]  ;;  %v49_v1 = vld [vmem:[#allocation4 + $0x8] sm:$0xff]  ;;  %s1609_s21 = smov 127   ;;  %s1610_s0 = smov 126  }
  0x13   :  { %v50_v2 = vld [vmem:[#allocation4 + $0x10] sm:$0xff]  ;;  %v51_v3 = vld [vmem:[#allocation4 + $0x18] sm:$0xff]  ;;  %v52_v4 = vld [vmem:[#allocation4 + $0x20] sm:$0xff]  ;;  %v1686_v8 = vpack.c.bf16 %v49_v1, %v49_v1  ;;  %v1688_v9 = vpack.c.bf16 %v48_v0, %v48_v0  ;;  %s1611_s22 = smov 110   ;;  %s1612_s23 = smov 109   ;;  %v1616_v14 = vmov 0  }
  0x14   :  { %v53_v5 = vld [vmem:[#allocation4 + $0x28] sm:$0xff]  ;;  %v54_v6 = vld [vmem:[#allocation4 + $0x30] sm:$0xff]  ;;  %v1684_v7 = vld [vmem:[#allocation4 + $0x38] sm:$0xff]  ;;  %v1695_v11 = vpack.c.bf16 %v50_v2, %v50_v2  ;;  %v1697_v12 = vpack.c.bf16 %v51_v3, %v51_v3  ;;  %v1703_v13 = vpack.c.bf16 %v52_v4, %v52_v4  ;;  %s1613_s24 = smov 108   ;;  %s1614_s25 = smov 92   ;;  %501 = vmatprep.mubr.bf16.mxu0 %v1616_v14  ;;  %542 = vmatprep.mubr.bf16.mxu1 %v1616_v14  ;;  %vm154_vm0 = vcmask 1039360  }
  0x15   :  { %v1499_v10 = vpack.c.bf16 %v1684_v7, %v54_v6  ;;  %140 = vrot.lane.b32.xlu0 %v1686_v8, %s1609_s21  ;;  %138 = vrot.lane.b32.xlu1 %v1688_v9, %s1609_s21  ;;  %s1615_s26 = smov 91   ;;  %s1617_s27 = smov 90   ;;  %v1777_v15 = vpack.c.bf16 %v53_v5, %v53_v5  ;;  %v1552_v16 = vpack.c.bf16 %v54_v6, %v54_v6  ;;  %vm330_vm1 = vcmask 1043456  }
  0x16   :  { %1539 = vset.pattern.permute.xlu1 %v1616_v14  ;;  %1538 = vset.pattern.permute.xlu0 %v1616_v14  ;;  %v1553_v17 = vpack.c.bf16 %v1684_v7, %v1684_v7  ;;  %vm178_vm2 = vcmask 1031168   ;;  %vm202_vm3 = vcmask 900096   ;;  %vm226_vm4 = vcmask 891904   ;;  %s1621_s16 = smov [#allocation7]  }
  0x17   :  { %91 = vst [vmem:[#allocation2 + $0x18] sm:$0xff] %v1499_v10  ;;  %vm250_vm5 = vcmask 883712   ;;  %vm274_vm6 = vcmask 752640   ;;  %vm298_vm7 = vcmask 744448   ;;  %vm322_vm8 = vcmask 736256   ;;  %s1438_s17 = sshll.u32 %s1621_s16, 4  ;;  %s1439_s17 = int_to_ptr.vmem [resolvable:$true] %s1438_s17 }
  0x18   :  { %vm444_vm9 = vcmask 588800   ;;  %vm1619_vm10 = vmmov 0   ;;  %vm1365_vm11 = vcmask 310272   ;;  %s1582_s18 = scalar_lea.vmem %s1439_s17, 768  ;;  %p1587_p9 = scmp.lt.s32.totalorder %s1439_s17, %s1439_s17 }
  0x19   :  { %142 = vrot.lane.b32.xlu0 %v1695_v11, %s1609_s21  ;;  %144 = vrot.lane.b32.xlu1 %v1697_v12, %s1609_s21  ;;  %p1583_p8 = scmp.ne.s32.totalorder %s1439_s17, %s1582_s18  ;;  %p1588_p10 = scmp.lt.s32.totalorder %s1582_s18, %s1582_s18 }
  0x1b   :  { %p1589_p11 = por %p1588_p10, %p1587_p9 }
  0x1d   :  { %146 = vrot.lane.b32.xlu0 %v1703_v13, %s1609_s21  ;;  %164 = vrot.lane.b32.xlu1 %v1686_v8, %s1610_s0  ;;  %p1590_p12 = pnand %p1589_p11, %p1583_p8 }
  0x21   :  { %166 = vrot.lane.b32.xlu0 %v1695_v11, %s1610_s0  ;;  %188 = vrot.lane.b32.xlu1 %v1686_v8, %s1611_s22 }
  0x25   :  { %190 = vrot.lane.b32.xlu0 %v1695_v11, %s1611_s22  ;;  %162 = vrot.lane.b32.xlu1 %v1688_v9, %s1610_s0 }
  0x29   :  { %186 = vrot.lane.b32.xlu0 %v1688_v9, %s1611_s22  ;;  %168 = vrot.lane.b32.xlu1 %v1697_v12, %s1610_s0 }
  0x2d   :  { %170 = vrot.lane.b32.xlu0 %v1703_v13, %s1610_s0  ;;  %192 = vrot.lane.b32.xlu1 %v1697_v12, %s1611_s22 }
  0x31   :  { %194 = vrot.lane.b32.xlu0 %v1703_v13, %s1611_s22  ;;  %212 = vrot.lane.b32.xlu1 %v1686_v8, %s1612_s23 }
  0x35   :  { %214 = vrot.lane.b32.xlu0 %v1695_v11, %s1612_s23  ;;  %236 = vrot.lane.b32.xlu1 %v1686_v8, %s1613_s24 }
  0x39   :  { %238 = vrot.lane.b32.xlu0 %v1695_v11, %s1613_s24  ;;  %210 = vrot.lane.b32.xlu1 %v1688_v9, %s1612_s23 }
  0x3d   :  { %234 = vrot.lane.b32.xlu0 %v1688_v9, %s1613_s24  ;;  %216 = vrot.lane.b32.xlu1 %v1697_v12, %s1612_s23 }
  0x41   :  { %218 = vrot.lane.b32.xlu0 %v1703_v13, %s1612_s23  ;;  %240 = vrot.lane.b32.xlu1 %v1697_v12, %s1613_s24 }
  0x45   :  { %242 = vrot.lane.b32.xlu0 %v1703_v13, %s1613_s24  ;;  %260 = vrot.lane.b32.xlu1 %v1686_v8, %s1614_s25 }
  0x49   :  { %262 = vrot.lane.b32.xlu0 %v1695_v11, %s1614_s25  ;;  %284 = vrot.lane.b32.xlu1 %v1686_v8, %s1615_s26 }
  0x4d   :  { %286 = vrot.lane.b32.xlu0 %v1695_v11, %s1615_s26  ;;  %258 = vrot.lane.b32.xlu1 %v1688_v9, %s1614_s25 }
  0x51   :  { %282 = vrot.lane.b32.xlu0 %v1688_v9, %s1615_s26  ;;  %264 = vrot.lane.b32.xlu1 %v1697_v12, %s1614_s25 }
  0x55   :  { %266 = vrot.lane.b32.xlu0 %v1703_v13, %s1614_s25  ;;  %288 = vrot.lane.b32.xlu1 %v1697_v12, %s1615_s26 }
  0x59   :  { %290 = vrot.lane.b32.xlu0 %v1703_v13, %s1615_s26  ;;  %306 = vrot.lane.b32.xlu1 %v1688_v9, %s1617_s27 }
  0x5d   :  { %308 = vrot.lane.b32.xlu0 %v1686_v8, %s1617_s27  ;;  %310 = vrot.lane.b32.xlu1 %v1695_v11, %s1617_s27 }
  0x61   :  { %148 = vrot.lane.b32.xlu0 %v1777_v15, %s1609_s21  ;;  %150 = vrot.lane.b32.xlu1 %v1552_v16, %s1609_s21 }
  0x65   :  { %312 = vrot.lane.b32.xlu0 %v1697_v12, %s1617_s27  ;;  %314 = vrot.lane.b32.xlu1 %v1703_v13, %s1617_s27 }
  0x69   :  { %172 = vrot.lane.b32.xlu0 %v1777_v15, %s1610_s0  ;;  %174 = vrot.lane.b32.xlu1 %v1552_v16, %s1610_s0 }
  0x6d   :  { %196 = vrot.lane.b32.xlu0 %v1777_v15, %s1611_s22  ;;  %198 = vrot.lane.b32.xlu1 %v1552_v16, %s1611_s22 }
  0x71   :  { %152 = vrot.lane.b32.xlu0 %v1553_v17, %s1609_s21  ;;  %220 = vrot.lane.b32.xlu1 %v1777_v15, %s1612_s23 }
  0x75   :  { %222 = vrot.lane.b32.xlu0 %v1552_v16, %s1612_s23  ;;  %244 = vrot.lane.b32.xlu1 %v1777_v15, %s1613_s24 }
  0x79   :  { %246 = vrot.lane.b32.xlu0 %v1552_v16, %s1613_s24  ;;  %176 = vrot.lane.b32.xlu1 %v1553_v17, %s1610_s0 }
  0x7d   :  { %200 = vrot.lane.b32.xlu0 %v1553_v17, %s1611_s22  ;;  %268 = vrot.lane.b32.xlu1 %v1777_v15, %s1614_s25 }
  0x81   :  { %270 = vrot.lane.b32.xlu0 %v1552_v16, %s1614_s25  ;;  %292 = vrot.lane.b32.xlu1 %v1777_v15, %s1615_s26 }
  0x85   :  { %294 = vrot.lane.b32.xlu0 %v1552_v16, %s1615_s26  ;;  %224 = vrot.lane.b32.xlu1 %v1553_v17, %s1612_s23 }
  0x87   :  { %v141_v18 = vpop.permute.xlu0 %140  ;;  %v139_v19 = vpop.permute.xlu1 %138 }
  0x88   :  { %v155_v20 = vsel %vm154_vm0, %v139_v19, %v141_v18 }
  0x89   :  { %248 = vrot.lane.b32.xlu0 %v1553_v17, %s1613_s24  ;;  %272 = vrot.lane.b32.xlu1 %v1553_v17, %s1614_s25  ;;  %v333_v25 = vsel %vm330_vm1, %v1688_v9, %v155_v20 }
  0x8b   :  { %v143_v21 = vpop.permute.xlu0 %142  ;;  %v145_v22 = vpop.permute.xlu1 %144 }
  0x8c   :  { %v156_v23 = vsel %vm154_vm0, %v141_v18, %v143_v21  ;;  %v157_v28 = vsel %vm154_vm0, %v143_v21, %v145_v22 }
  0x8d   :  { %296 = vrot.lane.b32.xlu0 %v1553_v17, %s1615_s26  ;;  %316 = vrot.lane.b32.xlu1 %v1777_v15, %s1617_s27  ;;  %v337_v24 = vsel %vm330_vm1, %v1686_v8, %v156_v23  ;;  %v341_v31 = vsel %vm330_vm1, %v1695_v11, %v157_v28 }
  0x8e   :  { %469 = vmatprep.subr.bf16.mxu0 %v337_v24 }
  0x8f   :  { %v1821_v26 = vpop.permute.xlu0 %146  ;;  %v165_v27 = vpop.permute.xlu1 %164  ;;  %470 = vmatpush1.bf16.msra.mxu0 %v333_v25 }
  0x90   :  { %v158_v29 = vsel %vm154_vm0, %v145_v22, %v1821_v26 }
  0x91   :  { %318 = vrot.lane.b32.xlu0 %v1552_v16, %s1617_s27  ;;  %320 = vrot.lane.b32.xlu1 %v1553_v17, %s1617_s27  ;;  %v345_v30 = vsel %vm330_vm1, %v1697_v12, %v158_v29 }
  0x92   :  { %510 = vmatprep.subr.bf16.mxu1 %v345_v30 }
  0x93   :  { %v167_v32 = vpop.permute.xlu0 %166  ;;  %511 = vmatpush1.bf16.msra.mxu1 %v341_v31  ;;  %v189_v33 = vpop.permute.xlu1 %188 }
  0x94   :  { %v180_v36 = vsel %vm178_vm2, %v165_v27, %v167_v32 }
  0x97   :  { %v191_v34 = vpop.permute.xlu0 %190  ;;  %v163_v35 = vpop.permute.xlu1 %162 }
  0x98   :  { %v204_v37 = vsel %vm202_vm3, %v189_v33, %v191_v34  ;;  %v179_v41 = vsel %vm178_vm2, %v163_v35, %v165_v27 }
  0x99   :  { %v365_v38 = vsel %vm330_vm1, %v180_v36, %v204_v37 }
  0x9a   :  { %471 = vmatprep.subr.bf16.mxu0 %v365_v38 }
  0x9b   :  { %v187_v39 = vpop.permute.xlu0 %186  ;;  %v169_v40 = vpop.permute.xlu1 %168 }
  0x9c   :  { %v203_v42 = vsel %vm202_vm3, %v187_v39, %v189_v33  ;;  %v181_v51 = vsel %vm178_vm2, %v167_v32, %v169_v40 }
  0x9d   :  { %v361_v43 = vsel %vm330_vm1, %v179_v41, %v203_v42 }
  0x9e   :  { %472 = vmatpush1.bf16.msra.mxu0 %v361_v43  ;;  %v1893_v43 = vld [vmem:[%s2327_s3] sm:$0xf] }
  0x9f   :  { %v1838_v44 = vpop.permute.xlu0 %170  ;;  %v193_v45 = vpop.permute.xlu1 %192 }
  0xa0   :  { %v205_v46 = vsel %vm202_vm3, %v191_v34, %v193_v45  ;;  %v182_v49 = vsel %vm178_vm2, %v169_v40, %v1838_v44 }
  0xa1   :  { %v369_v53 = vsel %vm330_vm1, %v181_v51, %v205_v46 }
  0xa3   :  { %v1841_v47 = vpop.permute.xlu0 %194  ;;  %v213_v48 = vpop.permute.xlu1 %212 }
  0xa4   :  { %v206_v50 = vsel %vm202_vm3, %v193_v45, %v1841_v47 }
  0xa5   :  { %v373_v52 = vsel %vm330_vm1, %v182_v49, %v206_v50 }
  0xa6   :  { %512 = vmatprep.subr.bf16.mxu1 %v373_v52 }
  0xa7   :  { %v215_v54 = vpop.permute.xlu0 %214  ;;  %513 = vmatpush1.bf16.msra.mxu1 %v369_v53  ;;  %v237_v55 = vpop.permute.xlu1 %236 }
  0xa8   :  { %v228_v58 = vsel %vm226_vm4, %v213_v48, %v215_v54 }
  0xab   :  { %v239_v56 = vpop.permute.xlu0 %238  ;;  %v211_v57 = vpop.permute.xlu1 %210 }
  0xac   :  { %v252_v59 = vsel %vm250_vm5, %v237_v55, %v239_v56  ;;  %v227_v63 = vsel %vm226_vm4, %v211_v57, %v213_v48 }
  0xad   :  { %v393_v60 = vsel %vm330_vm1, %v228_v58, %v252_v59 }
  0xae   :  { %473 = vmatprep.subr.bf16.mxu0 %v393_v60 }
  0xaf   :  { %v235_v61 = vpop.permute.xlu0 %234  ;;  %v217_v62 = vpop.permute.xlu1 %216 }
  0xb0   :  { %v251_v0 = vsel %vm250_vm5, %v235_v61, %v237_v55  ;;  %v229_v9 = vsel %vm226_vm4, %v215_v54, %v217_v62 }
  0xb1   :  { %v389_v1 = vsel %vm330_vm1, %v227_v63, %v251_v0 }
  0xb2   :  { %474 = vmatpush1.bf16.msra.mxu0 %v389_v1  ;;  %v1540_v1 = vld [vmem:[#allocation2 + $0x18] ss:$0 sps:$4 sm:$0xff]  }
  0xb3   :  { %v1856_v2 = vpop.permute.xlu0 %218  ;;  %v241_v3 = vpop.permute.xlu1 %240 }
  0xb4   :  { %v253_v4 = vsel %vm250_vm5, %v239_v56, %v241_v3  ;;  %v230_v7 = vsel %vm226_vm4, %v217_v62, %v1856_v2 }
  0xb5   :  { %v397_v11 = vsel %vm330_vm1, %v229_v9, %v253_v4 }
  0xb7   :  { %v1859_v5 = vpop.permute.xlu0 %242  ;;  %v261_v6 = vpop.permute.xlu1 %260 }
  0xb8   :  { %v254_v8 = vsel %vm250_vm5, %v241_v3, %v1859_v5 }
  0xb9   :  { %v401_v10 = vsel %vm330_vm1, %v230_v7, %v254_v8 }
  0xba   :  { %514 = vmatprep.subr.bf16.mxu1 %v401_v10 }
  0xbb   :  { %v263_v12 = vpop.permute.xlu0 %262  ;;  %515 = vmatpush1.bf16.msra.mxu1 %v397_v11  ;;  %v285_v16 = vpop.permute.xlu1 %284 }
  0xbc   :  { %v276_v19 = vsel %vm274_vm6, %v261_v6, %v263_v12 }
  0xbf   :  { %v287_v17 = vpop.permute.xlu0 %286  ;;  %v259_v18 = vpop.permute.xlu1 %258 }
  0xc0   :  { %v300_v20 = vsel %vm298_vm7, %v285_v16, %v287_v17  ;;  %v275_v24 = vsel %vm274_vm6, %v259_v18, %v261_v6 }
  0xc1   :  { %v421_v21 = vsel %vm330_vm1, %v276_v19, %v300_v20 }
  0xc2   :  { %475 = vmatprep.subr.bf16.mxu0 %v421_v21 }
  0xc3   :  { %v283_v22 = vpop.permute.xlu0 %282  ;;  %v265_v23 = vpop.permute.xlu1 %264 }
  0xc4   :  { %v299_v25 = vsel %vm298_vm7, %v283_v22, %v285_v16  ;;  %v277_v35 = vsel %vm274_vm6, %v263_v12, %v265_v23 }
  0xc5   :  { %v417_v27 = vsel %vm330_vm1, %v275_v24, %v299_v25 }
  0xc6   :  { %476 = vmatpush1.bf16.msra.mxu0 %v417_v27 }
  0xc7   :  { %v1874_v28 = vpop.permute.xlu0 %266  ;;  %v289_v29 = vpop.permute.xlu1 %288 }
  0xc8   :  { %v301_v30 = vsel %vm298_vm7, %v287_v17, %v289_v29  ;;  %v278_v33 = vsel %vm274_vm6, %v265_v23, %v1874_v28 }
  0xc9   :  { %v425_v37 = vsel %vm330_vm1, %v277_v35, %v301_v30 }
  0xcb   :  { %v1877_v31 = vpop.permute.xlu0 %290  ;;  %v307_v32 = vpop.permute.xlu1 %306 }
  0xcc   :  { %v302_v34 = vsel %vm298_vm7, %v289_v29, %v1877_v31 }
  0xcd   :  { %v429_v36 = vsel %vm330_vm1, %v278_v33, %v302_v34 }
  0xce   :  { %516 = vmatprep.subr.bf16.mxu1 %v429_v36 }
  0xcf   :  { %v309_v38 = vpop.permute.xlu0 %308  ;;  %517 = vmatpush1.bf16.msra.mxu1 %v425_v37  ;;  %v311_v39 = vpop.permute.xlu1 %310 }
  0xd0   :  { %v324_v40 = vsel %vm322_vm8, %v309_v38, %v311_v39  ;;  %v323_v41 = vsel %vm322_vm8, %v307_v32, %v309_v38 }
  0xd1   :  { %1466 = vmatprep.subr.msk.bf16.mxu0 %vm330_vm1, %v324_v40  ;;  %v449_v42 = vsel %vm330_vm1, %v323_v41, 0 }
  0xd2   :  { %478 = vmatpush1.bf16.msra.mxu0 %v449_v42 }
  0xd3   :  { %v149_v45 = vpop.permute.xlu0 %148  ;;  %v151_v46 = vpop.permute.xlu1 %150 }
  0xd4   :  { %v159_v48 = vsel %vm154_vm0, %v1821_v26, %v149_v45  ;;  %v160_v49 = vsel %vm154_vm0, %v149_v45, %v151_v46 }
  0xd5   :  { %v353_v50 = vsel %vm330_vm1, %v1777_v15, %v160_v49  ;;  %1467 = vmatmul.mubr.msk.bf16.vlgmr.msra.gmra.mrb[0].mxu0 %vm444_vm9, %v1893_v43  ;;  %v349_v51 = vsel %vm330_vm1, %v1703_v13, %v159_v48  ;;  %v1618_v13 = vmov 0.0  }
  0xd6   :  { %551 = vmatprep.subr.bf16.mxu0 %v353_v50  ;;  %583 = vmatprep.mubr.bf16.mxu0 %v1616_v14 }
  0xd7   :  { %v313_v52 = vpop.permute.xlu0 %312  ;;  %v1905_v53 = vpop.permute.xlu1 %314  ;;  %552 = vmatpush1.bf16.msra.mxu0 %v349_v51 }
  0xd8   :  { %v325_v26 = vsel %vm322_vm8, %v311_v39, %v313_v52  ;;  %v326_v54 = vsel %vm322_vm8, %v313_v52, %v1905_v53 }
  0xd9   :  { %1468 = vmatprep.subr.msk.bf16.mxu1 %vm330_vm1, %v326_v54  ;;  %v455_v15 = vsel %vm330_vm1, %v325_v26, 0  ;;  %v633_v26 = vlaneseq }
  0xda   :  { %519 = vmatpush1.bf16.msra.mxu1 %v455_v15 }
  0xdb   :  { %v173_v55 = vpop.permute.xlu0 %172  ;;  %v175_v56 = vpop.permute.xlu1 %174  ;;  %1510 = vmatprep.subr.bf16.mxu1 %v1618_v13  ;;  %v1971_v54 = vshrl.u32 %v633_v26, 7 }
  0xdc   :  { %v183_v59 = vsel %vm178_vm2, %v1838_v44, %v173_v55  ;;  %v184_v60 = vsel %vm178_vm2, %v173_v55, %v175_v56  ;;  %v46_v55 = vld [vmem:[%s2325_s1] sm:$0xff] }
  0xdd   :  { %1469 = vmatmul.mubr.msk.bf16.vlgmr.msra.gmra.mrb[0].mxu1 %vm444_vm9, %v1893_v43  ;;  %v635_v15 = vsub.s32 0, %v1971_v54 }
  0xde   :  { %1520 = vmatprep.mubr.msk.bf16.mxu1 %vm1619_vm10, %v1618_v13 }
  0xdf   :  { %v197_v57 = vpop.permute.xlu0 %196  ;;  %v199_v58 = vpop.permute.xlu1 %198 }
  0xe0   :  { %v207_v61 = vsel %vm202_vm3, %v1841_v47, %v197_v57  ;;  %v208_v62 = vsel %vm202_vm3, %v197_v57, %v199_v58 }
  0xe1   :  { %v381_v63 = vsel %vm330_vm1, %v184_v60, %v208_v62  ;;  %v377_v0 = vsel %vm330_vm1, %v183_v59, %v207_v61  ;;  %v643_v60 = vsub.s32 2, %v1971_v54 }
  0xe2   :  { %553 = vmatprep.subr.bf16.mxu0 %v381_v63  ;;  %v647_v63 = vsub.s32 3, %v1971_v54 }
  0xe3   :  { %v153_v3 = vpop.permute.xlu0 %152  ;;  %v221_v4 = vpop.permute.xlu1 %220  ;;  %554 = vmatpush1.bf16.msra.mxu0 %v377_v0 }
  0xe4   :  { %v161_v6 = vsel %vm154_vm0, %v151_v46, %v153_v3  ;;  %v231_v16 = vsel %vm226_vm4, %v1856_v2, %v221_v4  ;;  %v1992_v3 = vrot.slane %v46_v55, %v643_v60 }
  0xe5   :  { %v357_v44 = vsel %vm330_vm1, %v1540_v1, %v161_v6 }
  0xe6   :  { %1511 = vmatpush3.bf16.msra.mxu1 %v357_v44 }
  0xe7   :  { %v223_v7 = vpop.permute.xlu0 %222  ;;  %v245_v8 = vpop.permute.xlu1 %244  ;;  %1512 = vmatprep.subr.bf16.mxu1 %v1618_v13 }
  0xe8   :  { %v255_v47 = vsel %vm250_vm5, %v1859_v5, %v245_v8  ;;  %v232_v11 = vsel %vm226_vm4, %v221_v4, %v223_v7  ;;  %v1996_v4 = vrot.slane %v46_v55, %v647_v63 }
  0xe9   :  { %v405_v18 = vsel %vm330_vm1, %v231_v16, %v255_v47  ;;  %v655_v16 = vsub.s32 5, %v1971_v54 }
  0xeb   :  { %v247_v9 = vpop.permute.xlu0 %246  ;;  %v177_v10 = vpop.permute.xlu1 %176 }
  0xec   :  { %v256_v12 = vsel %vm250_vm5, %v245_v8, %v247_v9  ;;  %v185_v21 = vsel %vm178_vm2, %v175_v56, %v177_v10  ;;  %v1980_v56 = vrot.slane %v46_v55, %v635_v15 }
  0xed   :  { %v409_v17 = vsel %vm330_vm1, %v232_v11, %v256_v12  ;;  %v651_v12 = vsub.s32 4, %v1971_v54 }
  0xee   :  { %555 = vmatprep.subr.bf16.mxu0 %v409_v17  ;;  %v659_v17 = vsub.s32 6, %v1971_v54 }
  0xef   :  { %v201_v19 = vpop.permute.xlu0 %200  ;;  %v269_v20 = vpop.permute.xlu1 %268  ;;  %556 = vmatpush1.bf16.msra.mxu0 %v405_v18  ;;  %v2005_v18 = vrot.slane %v46_v55, %v651_v12 }
  0xf0   :  { %v209_v5 = vsel %vm202_vm3, %v199_v58, %v201_v19  ;;  %v279_v32 = vsel %vm274_vm6, %v1874_v28, %v269_v20  ;;  %v2009_v19 = vrot.slane %v46_v55, %v655_v16 }
  0xf1   :  { %v385_v22 = vsel %vm330_vm1, %v185_v21, %v209_v5 }
  0xf2   :  { %1513 = vmatpush3.bf16.msra.mxu1 %v385_v22 }
  0xf3   :  { %v271_v23 = vpop.permute.xlu0 %270  ;;  %v293_v24 = vpop.permute.xlu1 %292  ;;  %1514 = vmatprep.subr.bf16.mxu1 %v1618_v13 }
  0xf4   :  { %v303_v2 = vsel %vm298_vm7, %v1877_v31, %v293_v24  ;;  %v280_v29 = vsel %vm274_vm6, %v269_v20, %v271_v23  ;;  %v2011_v20 = vrot.slane %v46_v55, %v659_v17 }
  0xf5   :  { %v433_v34 = vsel %vm330_vm1, %v279_v32, %v303_v2 }
  0xf7   :  { %v295_v25 = vpop.permute.xlu0 %294  ;;  %v225_v27 = vpop.permute.xlu1 %224 }
  0xf8   :  { %v304_v30 = vsel %vm298_vm7, %v293_v24, %v295_v25  ;;  %v233_v37 = vsel %vm226_vm4, %v223_v7, %v225_v27 }
  0xf9   :  { %v437_v33 = vsel %vm330_vm1, %v280_v29, %v304_v30 }
  0xfa   :  { %557 = vmatprep.subr.bf16.mxu0 %v437_v33 }
  0xfb   :  { %v249_v35 = vpop.permute.xlu0 %248  ;;  %v273_v36 = vpop.permute.xlu1 %272  ;;  %558 = vmatpush1.bf16.msra.mxu0 %v433_v34 }
  0xfc   :  { %v257_v31 = vsel %vm250_vm5, %v247_v9, %v249_v35  ;;  %v281_v28 = vsel %vm274_vm6, %v271_v23, %v273_v36  ;;  %v723_v36 = vld [vmem:[%s2328_s4] sm:$0xff] }
  0xfd   :  { %v413_v38 = vsel %vm330_vm1, %v233_v37, %v257_v31 }
  0xfe   :  { %1515 = vmatpush3.bf16.msra.mxu1 %v413_v38 }
  0xff   :  { %v297_v39 = vpop.permute.xlu0 %296  ;;  %v317_v40 = vpop.permute.xlu1 %316  ;;  %1516 = vmatprep.subr.bf16.mxu1 %v1618_v13 }
 0x100   :  { %v305_v41 = vsel %vm298_vm7, %v295_v25, %v297_v39  ;;  %v327_v45 = vsel %vm322_vm8, %v1905_v53, %v317_v40  ;;  %v736_v53 = vld [vmem:[%s2329_s5] sm:$0xff] }
 0x101   :  { %v441_v42 = vsel %vm330_vm1, %v281_v28, %v305_v41  ;;  %v461_v51 = vsel %vm330_vm1, %v327_v45, 0  ;;  %739 = vperm.xlu1 %1539, %v736_v53  }
 0x102   :  { %1517 = vmatpush3.bf16.msra.mxu1 %v441_v42 }
 0x103   :  { %v319_v46 = vpop.permute.xlu0 %318  ;;  %v321_v48 = vpop.permute.xlu1 %320  ;;  %1518 = vmatprep.subr.bf16.mxu1 %v1618_v13 }
 0x104   :  { %v328_v49 = vsel %vm322_vm8, %v317_v40, %v319_v46  ;;  %v329_v50 = vsel %vm322_vm8, %v319_v46, %v321_v48 }
 0x105   :  { %v467_v52 = vsel %vm330_vm1, %v329_v50, 0  ;;  %1470 = vmatprep.subr.msk.bf16.mxu0 %vm330_vm1, %v328_v49 }
 0x106   :  { %560 = vmatpush1.bf16.msra.mxu0 %v461_v51  ;;  %1519 = vmatpush3.bf16.msra.mxu1 %v467_v52 }
 0x109   :  { %1471 = vmatmul.mubr.msk.bf16.vlgmr.msra.gmra.mrb[4].mxu0 %vm444_vm9, %v1893_v43  ;;  %1521 = vmatmul.mubr.msk.bf16.vlgmr.msra.gmra.mrb[4].mxu1 %vm444_vm9, %v1893_v43  ;;  %v639_v43 = vsub.s32 1, %v1971_v54 }
 0x10a   :  { %1146 = vmatprep.mubr.bf16.mxu0 %v1616_v14  ;;  %1187 = vmatprep.mubr.bf16.mxu1 %v1616_v14 }
 0x10b   :  { %v1984_v13 = vrot.slane %v46_v55, %v639_v43 }
 0x1a8   :  { %v503_v57 = vpop.f32.mrb[0].mxu0 }
 0x1a9   :  { %v668_v58 = vmul.f32 %v1980_v56, %v503_v57  ;;  %v505_v59 = vpop.f32.mrb[1].mxu0 }
 0x1aa   :  { %v669_v61 = vmul.f32 %v1984_v13, %v505_v59  ;;  %v507_v62 = vpop.f32.mrb[2].mxu0 }
 0x1ab   :  { %v508_v0 = vpop.f32.mrb[3].mxu0 }
 0x1ac   :  { %v675_v1 = vadd.f32 %v669_v61, %v668_v58 }
 0x1b0   :  { %v544_v6 = vpop.f32.mrb[0].mxu1 }
 0x1b1   :  { %v670_v44 = vmul.f32 %v1992_v3, %v544_v6  ;;  %v546_v7 = vpop.f32.mrb[1].mxu1 }
 0x1b2   :  { %v671_v8 = vmul.f32 %v1996_v4, %v546_v7  ;;  %v548_v47 = vpop.f32.mrb[2].mxu1 }
 0x1b3   :  { %v676_v9 = vadd.f32 %v675_v1, %v670_v44  ;;  %v549_v10 = vpop.f32.mrb[3].mxu1  ;;  %v740_v47 = vpop.permute.xlu1 %739 }
 0x1b5   :  { %v677_v11 = vadd.f32 %v676_v9, %v671_v8 }
 0x1dc   :  { %v585_v21 = vpop.f32.mrb[4].mxu0  ;;  %v626_v5 = vpop.f32.mrb[4].mxu1 }
 0x1dd   :  { %v672_v22 = vmul.f32 %v2005_v18, %v585_v21  ;;  %v587_v23 = vpop.f32.mrb[5].mxu0  ;;  %v1522_v24 = vpop.f32.mrb[5].mxu1  ;;  %v674_v30 = vmul.f32 %v2011_v20, %v626_v5 }
 0x1de   :  { %v673_v2 = vmul.f32 %v2009_v19, %v587_v23  ;;  %v589_v25 = vpop.f32.mrb[6].mxu0  ;;  %v629_v27 = vpop.f32.mrb[6].mxu1 }
 0x1df   :  { %v678_v29 = vadd.f32 %v677_v11, %v672_v22  ;;  %v590_v32 = vpop.f32.mrb[7].mxu0  ;;  %v1523_v33 = vpop.f32.mrb[7].mxu1 }
 0x1e1   :  { %v679_v34 = vadd.f32 %v678_v29, %v673_v2 }
 0x1e3   :  { %v680_v35 = vadd.f32 %v679_v34, %v674_v30 }
 0x1e5   :  { %681 = vadd.xlane.f32.xlu0 %v680_v35 }
 0x1fb   :  { %726 = vperm.xlu0 %1538, %v723_v36  }
 0x272   :  { %v682_v37 = vpop.xlane.xlu0 %681 }
 0x273   :  { %v683_v31 = vmul.f32 0.001953125, %v682_v37 }
 0x275   :  { %v684_v38 = vsub.f32 %v503_v57, %v683_v31  ;;  %v685_v39 = vsub.f32 %v505_v59, %v683_v31  ;;  %v686_v40 = vsub.f32 %v544_v6, %v683_v31  ;;  %v687_v28 = vsub.f32 %v546_v7, %v683_v31 }
 0x276   :  { %v688_v41 = vsub.f32 %v585_v21, %v683_v31  ;;  %v689_v48 = vsub.f32 %v587_v23, %v683_v31  ;;  %v690_v52 = vsub.f32 %v626_v5, %v683_v31 }
 0x277   :  { %v691_v42 = vmul.f32 %v684_v38, %v1980_v56  ;;  %v692_v45 = vmul.f32 %v685_v39, %v1984_v13  ;;  %v693_v46 = vmul.f32 %v686_v40, %v1992_v3  ;;  %v694_v49 = vmul.f32 %v687_v28, %v1996_v4 }
 0x278   :  { %v695_v53 = vmul.f32 %v688_v41, %v2005_v18  ;;  %v696_v57 = vmul.f32 %v689_v48, %v2009_v19  ;;  %v697_v61 = vmul.f32 %v690_v52, %v2011_v20 }
 0x279   :  { %v698_v50 = vmul.f32 %v691_v42, %v691_v42  ;;  %v699_v51 = vmul.f32 %v692_v45, %v692_v45  ;;  %v700_v26 = vmul.f32 %v693_v46, %v693_v46  ;;  %v701_v58 = vmul.f32 %v694_v49, %v694_v49 }
 0x27a   :  { %v702_v62 = vmul.f32 %v695_v53, %v695_v53  ;;  %v703_v1 = vmul.f32 %v696_v57, %v696_v57  ;;  %v704_v44 = vmul.f32 %v697_v61, %v697_v61  ;;  %v727_v21 = vpop.permute.xlu0 %726 }
 0x27b   :  { %v705_v55 = vadd.f32 %v699_v51, %v698_v50 }
 0x27d   :  { %v706_v59 = vadd.f32 %v705_v55, %v700_v26 }
 0x27f   :  { %v707_v0 = vadd.f32 %v706_v59, %v701_v58 }
 0x281   :  { %v708_v6 = vadd.f32 %v707_v0, %v702_v62 }
 0x283   :  { %v709_v7 = vadd.f32 %v708_v6, %v703_v1 }
 0x285   :  { %v710_v8 = vadd.f32 %v709_v7, %v704_v44 }
 0x287   :  { %711 = vadd.xlane.f32.xlu1 %v710_v8 }
 0x314   :  { %v712_v9 = vpop.xlane.xlu1 %711 }
 0x315   :  { %v713_v10 = vmul.f32 0.001953125, %v712_v9 }
 0x317   :  { %v714_v11 = vadd.f32 1e-05, %v713_v10 }
 0x319   :  { %1542 = vrsqrt.f32 %v714_v11 }
 0x323   :  { %v1543_v17 = vpop.eup %1542 }
 0x324   :  { %v716_v5 = vmul.f32 %v1543_v17, %v691_v42  ;;  %v717_v22 = vmul.f32 %v1543_v17, %v692_v45  ;;  %v718_v23 = vmul.f32 %v1543_v17, %v693_v46  ;;  %v719_v24 = vmul.f32 %v1543_v17, %v694_v49 }
 0x325   :  { %v720_v2 = vmul.f32 %v1543_v17, %v695_v53  ;;  %v721_v25 = vmul.f32 %v1543_v17, %v696_v57  ;;  %v722_v27 = vmul.f32 %v1543_v17, %v697_v61 }
 0x326   :  { %v729_v29 = vmul.f32 %v727_v21, %v716_v5  ;;  %v730_v30 = vmul.f32 %v727_v21, %v717_v22  ;;  %v731_v32 = vmul.f32 %v727_v21, %v718_v23  ;;  %v732_v33 = vmul.f32 %v727_v21, %v719_v24 }
 0x327   :  { %v733_v34 = vmul.f32 %v727_v21, %v720_v2  ;;  %v734_v35 = vmul.f32 %v727_v21, %v721_v25  ;;  %v735_v36 = vmul.f32 %v727_v21, %v722_v27 }
 0x328   :  { %v742_v37 = vadd.f32 %v740_v47, %v729_v29  ;;  %v743_v31 = vadd.f32 %v740_v47, %v730_v30  ;;  %v744_v38 = vadd.f32 %v740_v47, %v731_v32  ;;  %v745_v39 = vadd.f32 %v740_v47, %v732_v33 }
 0x329   :  { %v746_v40 = vadd.f32 %v740_v47, %v733_v34  ;;  %v747_v28 = vadd.f32 %v740_v47, %v734_v35  ;;  %v748_v41 = vadd.f32 %v740_v47, %v735_v36 }
 0x32a   :  { %v749_v42 = vmax.f32 %v742_v37, 0.0  ;;  %v750_v45 = vmax.f32 %v743_v31, 0.0  ;;  %v751_v46 = vmax.f32 %v744_v38, 0.0  ;;  %v752_v48 = vmax.f32 %v745_v39, 0.0 }
 0x32b   :  { %v753_v49 = vmax.f32 %v746_v40, 0.0  ;;  %v754_v50 = vmax.f32 %v747_v28, 0.0  ;;  %v755_v51 = vmax.f32 %v748_v41, 0.0 }
 0x32c   :  { %v756_v52 = vmul.f32 %v749_v42, %v1980_v56  ;;  %v757_v53 = vmul.f32 %v750_v45, %v1984_v13  ;;  %v758_v26 = vmul.f32 %v751_v46, %v1992_v3  ;;  %v759_v55 = vmul.f32 %v752_v48, %v1996_v4 }
 0x32d   :  { %v760_v57 = vmul.f32 %v753_v49, %v2005_v18  ;;  %v761_v58 = vmul.f32 %v754_v50, %v2009_v19  ;;  %v762_v59 = vmul.f32 %v755_v51, %v2011_v20 }
 0x32e   :  { %v2033_v62 = vpack.c.bf16 %v758_v26, %v758_v26  ;;  %v2035_v0 = vpack.c.bf16 %v757_v53, %v757_v53  ;;  %v2041_v56 = vpack.c.bf16 %v756_v52, %v756_v52  ;;  %v2087_v4 = vpack.c.bf16 %v759_v55, %v759_v55 }
 0x32f   :  { %v1503_v61 = vpack.c.bf16 %v762_v59, %v762_v59  ;;  %v2071_v13 = vpack.c.bf16 %v760_v57, %v760_v57  ;;  %v2081_v3 = vpack.c.bf16 %v761_v58, %v761_v58 }
 0x330   :  { %880 = vrot.lane.b32.xlu0 %v2033_v62, %s1611_s22  ;;  %838 = vrot.lane.b32.xlu1 %v2035_v0, %s1609_s21 }
 0x331   :  { %795 = vst [vmem:[#allocation3 + $0x18] sm:$0xf] %v1503_v61 }
 0x334   :  { %840 = vrot.lane.b32.xlu1 %v2033_v62, %s1609_s21  ;;  %876 = vrot.lane.b32.xlu0 %v2041_v56, %s1611_s22 }
 0x338   :  { %900 = vrot.lane.b32.xlu0 %v2033_v62, %s1612_s23  ;;  %836 = vrot.lane.b32.xlu1 %v2041_v56, %s1609_s21  ;;  %v1541_v18 = vld [vmem:[#allocation3 + $0x18] ss:$0 sps:$4 sm:$0xff]  }
 0x33c   :  { %920 = vrot.lane.b32.xlu0 %v2033_v62, %s1613_s24  ;;  %858 = vrot.lane.b32.xlu1 %v2035_v0, %s1610_s0 }
 0x340   :  { %916 = vrot.lane.b32.xlu0 %v2041_v56, %s1613_s24  ;;  %860 = vrot.lane.b32.xlu1 %v2033_v62, %s1610_s0 }
 0x344   :  { %940 = vrot.lane.b32.xlu0 %v2033_v62, %s1614_s25  ;;  %878 = vrot.lane.b32.xlu1 %v2035_v0, %s1611_s22 }
 0x348   :  { %960 = vrot.lane.b32.xlu0 %v2033_v62, %s1615_s26  ;;  %856 = vrot.lane.b32.xlu1 %v2041_v56, %s1610_s0 }
 0x34c   :  { %956 = vrot.lane.b32.xlu0 %v2041_v56, %s1615_s26  ;;  %898 = vrot.lane.b32.xlu1 %v2035_v0, %s1612_s23 }
 0x350   :  { %844 = vrot.lane.b32.xlu0 %v2071_v13, %s1609_s21  ;;  %918 = vrot.lane.b32.xlu1 %v2035_v0, %s1613_s24 }
 0x354   :  { %978 = vrot.lane.b32.xlu0 %v2035_v0, %s1617_s27  ;;  %896 = vrot.lane.b32.xlu1 %v2041_v56, %s1612_s23 }
 0x358   :  { %846 = vrot.lane.b32.xlu0 %v2081_v3, %s1609_s21  ;;  %938 = vrot.lane.b32.xlu1 %v2035_v0, %s1614_s25 }
 0x35c   :  { %862 = vrot.lane.b32.xlu0 %v2087_v4, %s1610_s0  ;;  %958 = vrot.lane.b32.xlu1 %v2035_v0, %s1615_s26 }
 0x360   :  { %882 = vrot.lane.b32.xlu0 %v2087_v4, %s1611_s22  ;;  %936 = vrot.lane.b32.xlu1 %v2041_v56, %s1614_s25 }
 0x364   :  { %866 = vrot.lane.b32.xlu0 %v2081_v3, %s1610_s0  ;;  %842 = vrot.lane.b32.xlu1 %v2087_v4, %s1609_s21 }
 0x368   :  { %886 = vrot.lane.b32.xlu0 %v2081_v3, %s1611_s22  ;;  %976 = vrot.lane.b32.xlu1 %v2041_v56, %s1617_s27 }
 0x36c   :  { %902 = vrot.lane.b32.xlu0 %v2087_v4, %s1612_s23  ;;  %980 = vrot.lane.b32.xlu1 %v2033_v62, %s1617_s27 }
 0x370   :  { %922 = vrot.lane.b32.xlu0 %v2087_v4, %s1613_s24  ;;  %848 = vrot.lane.b32.xlu1 %v1541_v18, %s1609_s21 }
 0x374   :  { %906 = vrot.lane.b32.xlu0 %v2081_v3, %s1612_s23  ;;  %864 = vrot.lane.b32.xlu1 %v2071_v13, %s1610_s0 }
 0x378   :  { %926 = vrot.lane.b32.xlu0 %v2081_v3, %s1613_s24  ;;  %884 = vrot.lane.b32.xlu1 %v2071_v13, %s1611_s22 }
 0x37c   :  { %942 = vrot.lane.b32.xlu0 %v2087_v4, %s1614_s25  ;;  %868 = vrot.lane.b32.xlu1 %v1541_v18, %s1610_s0 }
 0x380   :  { %962 = vrot.lane.b32.xlu0 %v2087_v4, %s1615_s26  ;;  %888 = vrot.lane.b32.xlu1 %v1541_v18, %s1611_s22 }
 0x384   :  { %946 = vrot.lane.b32.xlu0 %v2081_v3, %s1614_s25  ;;  %904 = vrot.lane.b32.xlu1 %v2071_v13, %s1612_s23 }
 0x388   :  { %966 = vrot.lane.b32.xlu0 %v2081_v3, %s1615_s26  ;;  %924 = vrot.lane.b32.xlu1 %v2071_v13, %s1613_s24 }
 0x38c   :  { %982 = vrot.lane.b32.xlu0 %v2087_v4, %s1617_s27  ;;  %908 = vrot.lane.b32.xlu1 %v1541_v18, %s1612_s23 }
 0x390   :  { %986 = vrot.lane.b32.xlu0 %v2081_v3, %s1617_s27  ;;  %928 = vrot.lane.b32.xlu1 %v1541_v18, %s1613_s24 }
 0x394   :  { %944 = vrot.lane.b32.xlu1 %v2071_v13, %s1614_s25 }
 0x398   :  { %964 = vrot.lane.b32.xlu1 %v2071_v13, %s1615_s26 }
 0x39c   :  { %948 = vrot.lane.b32.xlu1 %v1541_v18, %s1614_s25 }
 0x3a0   :  { %968 = vrot.lane.b32.xlu1 %v1541_v18, %s1615_s26 }
 0x3a2   :  { %v2146_v19 = vpop.permute.xlu0 %880  ;;  %v839_v20 = vpop.permute.xlu1 %838 }
 0x3a4   :  { %984 = vrot.lane.b32.xlu1 %v2071_v13, %s1617_s27 }
 0x3a6   :  { %v841_v1 = vpop.permute.xlu1 %840  ;;  %v877_v6 = vpop.permute.xlu0 %876 }
 0x3a7   :  { %v851_v44 = vsel %vm154_vm0, %v839_v20, %v841_v1 }
 0x3a8   :  { %988 = vrot.lane.b32.xlu1 %v1541_v18, %s1617_s27  ;;  %v1002_v7 = vsel %vm330_vm1, %v2035_v0, %v851_v44 }
 0x3a9   :  { %1114 = vmatprep.subr.bf16.mxu0 %v1002_v7 }
 0x3aa   :  { %v2154_v8 = vpop.permute.xlu0 %900  ;;  %v837_v47 = vpop.permute.xlu1 %836 }
 0x3ab   :  { %v850_v9 = vsel %vm154_vm0, %v837_v47, %v839_v20 }
 0x3ac   :  { %v998_v10 = vsel %vm330_vm1, %v2041_v56, %v850_v9 }
 0x3ad   :  { %1115 = vmatpush1.bf16.msra.mxu0 %v998_v10 }
 0x3ae   :  { %v2159_v11 = vpop.permute.xlu0 %920  ;;  %v859_v17 = vpop.permute.xlu1 %858 }
 0x3b2   :  { %v917_v21 = vpop.permute.xlu0 %916  ;;  %v2161_v5 = vpop.permute.xlu1 %860 }
 0x3b3   :  { %v871_v24 = vsel %vm178_vm2, %v859_v17, %v2161_v5 }
 0x3b6   :  { %v2163_v22 = vpop.permute.xlu0 %940  ;;  %v879_v23 = vpop.permute.xlu1 %878 }
 0x3b7   :  { %v891_v2 = vsel %vm202_vm3, %v879_v23, %v2146_v19  ;;  %v890_v30 = vsel %vm202_vm3, %v877_v6, %v879_v23 }
 0x3b8   :  { %v1026_v25 = vsel %vm330_vm1, %v871_v24, %v891_v2 }
 0x3b9   :  { %1116 = vmatprep.subr.bf16.mxu0 %v1026_v25 }
 0x3ba   :  { %v2170_v27 = vpop.permute.xlu0 %960  ;;  %v857_v29 = vpop.permute.xlu1 %856 }
 0x3bb   :  { %v870_v32 = vsel %vm178_vm2, %v857_v29, %v859_v17 }
 0x3bc   :  { %v1022_v33 = vsel %vm330_vm1, %v870_v32, %v890_v30 }
 0x3bd   :  { %1117 = vmatpush1.bf16.msra.mxu0 %v1022_v33 }
 0x3be   :  { %v957_v34 = vpop.permute.xlu0 %956  ;;  %v899_v35 = vpop.permute.xlu1 %898 }
 0x3bf   :  { %v911_v31 = vsel %vm226_vm4, %v899_v35, %v2154_v8 }
 0x3c2   :  { %v845_v36 = vpop.permute.xlu0 %844  ;;  %v919_v37 = vpop.permute.xlu1 %918 }
 0x3c3   :  { %v931_v38 = vsel %vm250_vm5, %v919_v37, %v2159_v11  ;;  %v930_v41 = vsel %vm250_vm5, %v917_v21, %v919_v37 }
 0x3c4   :  { %v1050_v39 = vsel %vm330_vm1, %v911_v31, %v931_v38 }
 0x3c5   :  { %1118 = vmatprep.subr.bf16.mxu0 %v1050_v39 }
 0x3c6   :  { %v979_v40 = vpop.permute.xlu0 %978  ;;  %v897_v28 = vpop.permute.xlu1 %896 }
 0x3c7   :  { %v910_v42 = vsel %vm226_vm4, %v897_v28, %v899_v35 }
 0x3c8   :  { %v1046_v45 = vsel %vm330_vm1, %v910_v42, %v930_v41 }
 0x3c9   :  { %1119 = vmatpush1.bf16.msra.mxu0 %v1046_v45 }
 0x3ca   :  { %v847_v46 = vpop.permute.xlu0 %846  ;;  %v939_v48 = vpop.permute.xlu1 %938 }
 0x3cb   :  { %v951_v51 = vsel %vm274_vm6, %v939_v48, %v2163_v22 }
 0x3ce   :  { %v863_v49 = vpop.permute.xlu0 %862  ;;  %v959_v50 = vpop.permute.xlu1 %958 }
 0x3cf   :  { %v971_v52 = vsel %vm298_vm7, %v959_v50, %v2170_v27  ;;  %v970_v57 = vsel %vm298_vm7, %v957_v34, %v959_v50  ;;  %v872_v34 = vsel %vm178_vm2, %v2161_v5, %v863_v49 }
 0x3d0   :  { %v1074_v53 = vsel %vm330_vm1, %v951_v51, %v971_v52 }
 0x3d1   :  { %1120 = vmatprep.subr.bf16.mxu0 %v1074_v53 }
 0x3d2   :  { %v883_v26 = vpop.permute.xlu0 %882  ;;  %v937_v55 = vpop.permute.xlu1 %936 }
 0x3d3   :  { %v950_v58 = vsel %vm274_vm6, %v937_v55, %v939_v48  ;;  %v892_v30 = vsel %vm202_vm3, %v2146_v19, %v883_v26 }
 0x3d4   :  { %v1070_v59 = vsel %vm330_vm1, %v950_v58, %v970_v57 }
 0x3d5   :  { %1121 = vmatpush1.bf16.msra.mxu0 %v1070_v59 }
 0x3d6   :  { %v867_v61 = vpop.permute.xlu0 %866  ;;  %v843_v0 = vpop.permute.xlu1 %842 }
 0x3d7   :  { %v852_v56 = vsel %vm154_vm0, %v841_v1, %v843_v0  ;;  %v853_v18 = vsel %vm154_vm0, %v843_v0, %v845_v36 }
 0x3d8   :  { %v1010_v20 = vsel %vm330_vm1, %v2087_v4, %v853_v18  ;;  %v1006_v6 = vsel %vm330_vm1, %v2033_v62, %v852_v56  ;;  %v2207_v62 = vld [vmem:[%s2330_s6] sm:$0xf]  ;;  %v854_v4 = vsel %vm154_vm0, %v845_v36, %v847_v46 }
 0x3d9   :  { %1155 = vmatprep.subr.bf16.mxu1 %v1010_v20  ;;  %v1014_v2 = vsel %vm330_vm1, %v2071_v13, %v854_v4  ;;  %v1030_v13 = vsel %vm330_vm1, %v872_v34, %v892_v30 }
 0x3da   :  { %1156 = vmatpush1.bf16.msra.mxu1 %v1006_v6  ;;  %v977_v44 = vpop.permute.xlu1 %976  ;;  %v887_v7 = vpop.permute.xlu0 %886 }
 0x3db   :  { %v990_v47 = vsel %vm322_vm8, %v977_v44, %v979_v40 }
 0x3dc   :  { %v1097_v1 = vsel %vm330_vm1, %v990_v47, 0 }
 0x3de   :  { %v2198_v9 = vpop.permute.xlu1 %980  ;;  %v903_v17 = vpop.permute.xlu0 %902 }
 0x3df   :  { %v991_v10 = vsel %vm322_vm8, %v979_v40, %v2198_v9  ;;  %v912_v50 = vsel %vm226_vm4, %v2154_v8, %v903_v17 }
 0x3e0   :  { %1490 = vmatprep.subr.msk.bf16.mxu0 %vm330_vm1, %v991_v10 }
 0x3e1   :  { %1123 = vmatpush1.bf16.msra.mxu0 %v1097_v1 }
 0x3e2   :  { %v849_v21 = vpop.permute.xlu1 %848  ;;  %v923_v29 = vpop.permute.xlu0 %922 }
 0x3e3   :  { %v855_v23 = vsel %vm154_vm0, %v847_v46, %v849_v21  ;;  %v932_v42 = vsel %vm250_vm5, %v2159_v11, %v923_v29 }
 0x3e4   :  { %v1018_v24 = vsel %vm330_vm1, %v2081_v3, %v855_v23  ;;  %1491 = vmatmul.mubr.msk.bf16.vlgmr.msra.gmra.mrb[8].mxu0 %vm444_vm9, %v2207_v62  ;;  %v1054_v52 = vsel %vm330_vm1, %v912_v50, %v932_v42 }
 0x3e5   :  { %1196 = vmatprep.subr.bf16.mxu0 %v1018_v24  ;;  %1228 = vmatprep.mubr.bf16.mxu0 %v1616_v14 }
 0x3e6   :  { %v865_v25 = vpop.permute.xlu1 %864  ;;  %1197 = vmatpush1.bf16.msra.mxu0 %v1014_v2  ;;  %v907_v14 = vpop.permute.xlu0 %906 }
 0x3e7   :  { %v873_v33 = vsel %vm178_vm2, %v863_v49, %v865_v25  ;;  %v874_v39 = vsel %vm178_vm2, %v865_v25, %v867_v61 }
 0x3ea   :  { %v885_v32 = vpop.permute.xlu1 %884  ;;  %v927_v40 = vpop.permute.xlu0 %926 }
 0x3eb   :  { %v893_v3 = vsel %vm202_vm3, %v883_v26, %v885_v32  ;;  %v894_v37 = vsel %vm202_vm3, %v885_v32, %v887_v7 }
 0x3ec   :  { %v1034_v35 = vsel %vm330_vm1, %v873_v33, %v893_v3  ;;  %v1038_v28 = vsel %vm330_vm1, %v874_v39, %v894_v37 }
 0x3ed   :  { %1157 = vmatprep.subr.bf16.mxu1 %v1034_v35 }
 0x3ee   :  { %1158 = vmatpush1.bf16.msra.mxu1 %v1030_v13  ;;  %v869_v36 = vpop.permute.xlu1 %868  ;;  %v943_v45 = vpop.permute.xlu0 %942 }
 0x3ef   :  { %v875_v19 = vsel %vm178_vm2, %v867_v61, %v869_v36 }
 0x3f2   :  { %v889_v31 = vpop.permute.xlu1 %888  ;;  %v963_v26 = vpop.permute.xlu0 %962 }
 0x3f3   :  { %v895_v38 = vsel %vm202_vm3, %v887_v7, %v889_v31  ;;  %v972_v18 = vsel %vm298_vm7, %v2170_v27, %v963_v26  ;;  %v952_v7 = vsel %vm274_vm6, %v2163_v22, %v943_v45 }
 0x3f4   :  { %v1042_v5 = vsel %vm330_vm1, %v875_v19, %v895_v38  ;;  %v1078_v1 = vsel %vm330_vm1, %v952_v7, %v972_v18 }
 0x3f5   :  { %1198 = vmatprep.subr.bf16.mxu0 %v1042_v5 }
 0x3f6   :  { %v905_v41 = vpop.permute.xlu1 %904  ;;  %1199 = vmatpush1.bf16.msra.mxu0 %v1038_v28  ;;  %v947_v0 = vpop.permute.xlu0 %946 }
 0x3f7   :  { %v913_v48 = vsel %vm226_vm4, %v903_v17, %v905_v41  ;;  %v914_v59 = vsel %vm226_vm4, %v905_v41, %v907_v14 }
 0x3fa   :  { %v925_v46 = vpop.permute.xlu1 %924  ;;  %v967_v47 = vpop.permute.xlu0 %966 }
 0x3fb   :  { %v933_v49 = vsel %vm250_vm5, %v923_v29, %v925_v46  ;;  %v934_v55 = vsel %vm250_vm5, %v925_v46, %v927_v40 }
 0x3fc   :  { %v1058_v51 = vsel %vm330_vm1, %v913_v48, %v933_v49  ;;  %v1062_v8 = vsel %vm330_vm1, %v914_v59, %v934_v55 }
 0x3fd   :  { %1159 = vmatprep.subr.bf16.mxu1 %v1058_v51 }
 0x3fe   :  { %1160 = vmatpush1.bf16.msra.mxu1 %v1054_v52  ;;  %v909_v53 = vpop.permute.xlu1 %908  ;;  %v983_v17 = vpop.permute.xlu0 %982 }
 0x3ff   :  { %v915_v57 = vsel %vm226_vm4, %v907_v14, %v909_v53  ;;  %v992_v25 = vsel %vm322_vm8, %v2198_v9, %v983_v17  ;;  %v47_v14 = vld [vmem:[%s2326_s2] sm:$0x3f] }
 0x400   :  { %v1103_v33 = vsel %vm330_vm1, %v992_v25, 0  ;;  %v1241_v36 = vrot.slane %v47_v14, %v635_v15  ;;  %v1245_v37 = vrot.slane %v47_v14, %v639_v43  ;;  %v1253_v41 = vrot.slane %v47_v14, %v647_v63 }
 0x401   :  { %v1257_v15 = vrot.slane %v47_v14, %v651_v12  ;;  %v1261_v49 = vrot.slane %v47_v14, %v655_v16  ;;  %v1316_v12 = vld [vmem:[%s2331_s7] sm:$0xff] }
 0x402   :  { %v929_v11 = vpop.permute.xlu1 %928  ;;  %v987_v3 = vpop.permute.xlu0 %986 }
 0x403   :  { %v935_v58 = vsel %vm250_vm5, %v927_v40, %v929_v11 }
 0x404   :  { %v1066_v61 = vsel %vm330_vm1, %v915_v57, %v935_v58 }
 0x405   :  { %1200 = vmatprep.subr.bf16.mxu0 %v1066_v61 }
 0x406   :  { %v945_v56 = vpop.permute.xlu1 %944  ;;  %1201 = vmatpush1.bf16.msra.mxu0 %v1062_v8 }
 0x407   :  { %v953_v6 = vsel %vm274_vm6, %v943_v45, %v945_v56  ;;  %v954_v2 = vsel %vm274_vm6, %v945_v56, %v947_v0 }
 0x40a   :  { %v965_v20 = vpop.permute.xlu1 %964 }
 0x40b   :  { %v973_v44 = vsel %vm298_vm7, %v963_v26, %v965_v20  ;;  %v974_v21 = vsel %vm298_vm7, %v965_v20, %v967_v47 }
 0x40c   :  { %v1082_v10 = vsel %vm330_vm1, %v953_v6, %v973_v44  ;;  %v1086_v29 = vsel %vm330_vm1, %v954_v2, %v974_v21 }
 0x40d   :  { %1161 = vmatprep.subr.bf16.mxu1 %v1082_v10 }
 0x40e   :  { %1162 = vmatpush1.bf16.msra.mxu1 %v1078_v1  ;;  %v949_v4 = vpop.permute.xlu1 %948 }
 0x40f   :  { %v955_v23 = vsel %vm274_vm6, %v947_v0, %v949_v4 }
 0x412   :  { %v969_v27 = vpop.permute.xlu1 %968 }
 0x413   :  { %v975_v24 = vsel %vm298_vm7, %v967_v47, %v969_v27 }
 0x414   :  { %v1090_v22 = vsel %vm330_vm1, %v955_v23, %v975_v24 }
 0x415   :  { %1202 = vmatprep.subr.bf16.mxu0 %v1090_v22 }
 0x416   :  { %v985_v30 = vpop.permute.xlu1 %984  ;;  %1203 = vmatpush1.bf16.msra.mxu0 %v1086_v29 }
 0x417   :  { %v993_v32 = vsel %vm322_vm8, %v983_v17, %v985_v30  ;;  %v994_v34 = vsel %vm322_vm8, %v985_v30, %v987_v3  ;;  %v1328_v30 = vld [vmem:[%s2332_s8] sm:$0xff]  ;;  %s1620_s8 = smov 38  }
 0x418   :  { %1492 = vmatprep.subr.msk.bf16.mxu1 %vm330_vm1, %v993_v32  ;;  %v1109_v9 = vsel %vm330_vm1, %v994_v34, 0 }
 0x419   :  { %1164 = vmatpush1.bf16.msra.mxu1 %v1103_v33 }
 0x41a   :  { %v989_v35 = vpop.permute.xlu1 %988 }
 0x41b   :  { %v995_v13 = vsel %vm322_vm8, %v987_v3, %v989_v35 }
 0x41c   :  { %1493 = vmatmul.mubr.msk.bf16.vlgmr.msra.gmra.mrb[8].mxu1 %vm444_vm9, %v2207_v62  ;;  %1494 = vmatprep.subr.msk.bf16.mxu0 %vm330_vm1, %v995_v13 }
 0x41d   :  { %1205 = vmatpush1.bf16.msra.mxu0 %v1109_v9 }
 0x420   :  { %1495 = vmatmul.mubr.msk.bf16.vlgmr.msra.gmra.mrb[12].mxu0 %vm444_vm9, %v2207_v62  ;;  %v1249_v62 = vrot.slane %v47_v14, %v643_v60 }
 0x4b7   :  { %v1148_v31 = vpop.f32.mrb[8].mxu0 }
 0x4b8   :  { %v1268_v19 = vmul.f32 %v1241_v36, %v1148_v31  ;;  %v1150_v38 = vpop.f32.mrb[9].mxu0 }
 0x4b9   :  { %v1269_v39 = vmul.f32 %v1245_v37, %v1150_v38  ;;  %v1152_v40 = vpop.f32.mrb[10].mxu0 }
 0x4ba   :  { %v1153_v5 = vpop.f32.mrb[11].mxu0 }
 0x4bb   :  { %v1274_v28 = vadd.f32 %v1269_v39, %v1268_v19 }
 0x4ef   :  { %v1189_v42 = vpop.f32.mrb[8].mxu1 }
 0x4f0   :  { %v1270_v45 = vmul.f32 %v1249_v62, %v1189_v42  ;;  %v1191_v46 = vpop.f32.mrb[9].mxu1 }
 0x4f1   :  { %v1271_v43 = vmul.f32 %v1253_v41, %v1191_v46  ;;  %v1193_v48 = vpop.f32.mrb[10].mxu1 }
 0x4f2   :  { %v1275_v50 = vadd.f32 %v1274_v28, %v1270_v45  ;;  %v1194_v51 = vpop.f32.mrb[11].mxu1  ;;  %v1340_v48 = vld [vmem:[#allocation4] sm:$0xff] }
 0x4f3   :  { %v1230_v52 = vpop.f32.mrb[12].mxu0 }
 0x4f4   :  { %v1276_v53 = vadd.f32 %v1275_v50, %v1271_v43  ;;  %v1272_v26 = vmul.f32 %v1257_v15, %v1230_v52  ;;  %v1232_v60 = vpop.f32.mrb[13].mxu0 }
 0x4f5   :  { %v1273_v55 = vmul.f32 %v1261_v49, %v1232_v60  ;;  %v1234_v11 = vpop.f32.mrb[14].mxu0 }
 0x4f6   :  { %v1277_v63 = vadd.f32 %v1276_v53, %v1272_v26  ;;  %v1235_v57 = vpop.f32.mrb[15].mxu0  ;;  %v1343_v11 = vld [vmem:[#allocation4 + $0x18] sm:$0xff] }
 0x4f8   :  { %v1278_v58 = vadd.f32 %v1277_v63, %v1273_v55  ;;  %v1342_v55 = vld [vmem:[#allocation4 + $0x10] sm:$0xff] }
 0x4fa   :  { %1279 = vadd.xlane.f32.xlu0 %v1278_v58 }
 0x510   :  { %1319 = vperm.xlu0 %1538, %v1316_v12  }
 0x587   :  { %v1280_v59 = vpop.xlane.xlu0 %1279 }
 0x588   :  { %v1281_v54 = vmul.f32 0.001953125, %v1280_v59 }
 0x58a   :  { %v1282_v16 = vsub.f32 %v1148_v31, %v1281_v54  ;;  %v1283_v61 = vsub.f32 %v1150_v38, %v1281_v54  ;;  %v1284_v8 = vsub.f32 %v1189_v42, %v1281_v54  ;;  %v1285_v0 = vsub.f32 %v1191_v46, %v1281_v54 }
 0x58b   :  { %v1286_v56 = vsub.f32 %v1230_v52, %v1281_v54  ;;  %v1287_v44 = vsub.f32 %v1232_v60, %v1281_v54 }
 0x58c   :  { %v1288_v18 = vmul.f32 %v1282_v16, %v1241_v36  ;;  %v1289_v20 = vmul.f32 %v1283_v61, %v1245_v37  ;;  %v1290_v6 = vmul.f32 %v1284_v8, %v1249_v62  ;;  %v1291_v7 = vmul.f32 %v1285_v0, %v1253_v41  ;;  %v1344_v61 = vld [vmem:[#allocation4 + $0x20] sm:$0xff]  ;;  %v1345_v8 = vld [vmem:[#allocation4 + $0x28] sm:$0xff] }
 0x58d   :  { %v1292_v1 = vmul.f32 %v1286_v56, %v1257_v15  ;;  %v1293_v21 = vmul.f32 %v1287_v44, %v1261_v49  ;;  %v1341_v49 = vld [vmem:[#allocation4 + $0x8] sm:$0xff] }
 0x58e   :  { %v1294_v47 = vmul.f32 %v1288_v18, %v1288_v18  ;;  %v1295_v10 = vmul.f32 %v1289_v20, %v1289_v20  ;;  %v1296_v4 = vmul.f32 %v1290_v6, %v1290_v6  ;;  %v1297_v27 = vmul.f32 %v1291_v7, %v1291_v7 }
 0x58f   :  { %v1298_v24 = vmul.f32 %v1292_v1, %v1292_v1  ;;  %v1299_v22 = vmul.f32 %v1293_v21, %v1293_v21  ;;  %v1320_v36 = vpop.permute.xlu0 %1319 }
 0x590   :  { %v1300_v17 = vadd.f32 %v1295_v10, %v1294_v47 }
 0x592   :  { %v1301_v23 = vadd.f32 %v1300_v17, %v1296_v4 }
 0x594   :  { %v1302_v2 = vadd.f32 %v1301_v23, %v1297_v27 }
 0x596   :  { %v1303_v25 = vadd.f32 %v1302_v2, %v1298_v24 }
 0x598   :  { %v1304_v29 = vadd.f32 %v1303_v25, %v1299_v22 }
 0x59a   :  { %1305 = vadd.xlane.f32.xlu1 %v1304_v29 }
 0x5ab   :  { %1331 = vperm.xlu1 %1539, %v1328_v30  }
 0x627   :  { %v1306_v32 = vpop.xlane.xlu1 %1305 }
 0x628   :  { %v1307_v33 = vmul.f32 0.001953125, %v1306_v32 }
 0x62a   :  { %v1308_v3 = vadd.f32 1e-05, %v1307_v33 }
 0x62b   :  { %v1332_v19 = vpop.permute.xlu1 %1331 }
 0x62c   :  { %1544 = vrsqrt.f32 %v1308_v3 }
 0x636   :  { %v1545_v34 = vpop.eup %1544 }
 0x637   :  { %v1311_v35 = vmul.f32 %v1545_v34, %v1289_v20  ;;  %v1310_v13 = vmul.f32 %v1545_v34, %v1288_v18  ;;  %v1313_v9 = vmul.f32 %v1545_v34, %v1291_v7  ;;  %v1312_v14 = vmul.f32 %v1545_v34, %v1290_v6  ;;  %v1346_v6 = vld [vmem:[#allocation4 + $0x30] sm:$0xff] }
 0x638   :  { %v1315_v38 = vmul.f32 %v1545_v34, %v1293_v21  ;;  %v1314_v39 = vmul.f32 %v1545_v34, %v1292_v1 }
 0x639   :  { %v1323_v37 = vmul.f32 %v1320_v36, %v1311_v35  ;;  %v1322_v31 = vmul.f32 %v1320_v36, %v1310_v13  ;;  %v1325_v28 = vmul.f32 %v1320_v36, %v1313_v9  ;;  %v1324_v62 = vmul.f32 %v1320_v36, %v1312_v14 }
 0x63a   :  { %v1327_v45 = vmul.f32 %v1320_v36, %v1315_v38  ;;  %v1326_v46 = vmul.f32 %v1320_v36, %v1314_v39 }
 0x63b   :  { %v1335_v40 = vadd.f32 %v1332_v19, %v1323_v37  ;;  %v1334_v5 = vadd.f32 %v1332_v19, %v1322_v31  ;;  %v1337_v41 = vadd.f32 %v1332_v19, %v1325_v28  ;;  %v1336_v42 = vadd.f32 %v1332_v19, %v1324_v62 }
 0x63c   :  { %v1339_v15 = vadd.f32 %v1332_v19, %v1327_v45  ;;  %v1338_v43 = vadd.f32 %v1332_v19, %v1326_v46 }
 0x63d   :  { %1355 = vrot.lane.b32.xlu1 %v1335_v40, %s1620_s8  ;;  %1353 = vrot.lane.b32.xlu0 %v1334_v5, %s1620_s8 }
 0x641   :  { %1359 = vrot.lane.b32.xlu1 %v1337_v41, %s1620_s8  ;;  %1357 = vrot.lane.b32.xlu0 %v1336_v42, %s1620_s8 }
 0x645   :  { %1363 = vrot.lane.b32.xlu1 %v1339_v15, %s1620_s8  ;;  %1361 = vrot.lane.b32.xlu0 %v1338_v43, %s1620_s8 }
 0x6af   :  { %v1356_v50 = vpop.permute.xlu1 %1355  ;;  %v1354_v51 = vpop.permute.xlu0 %1353 }
 0x6b0   :  { %v1366_v52 = vsel %vm1365_vm11, %v1354_v51, %v1356_v50  ;;  %v1378_v53 = vadd.f32 %v1354_v51, %v1340_v48 }
 0x6b1   :  { %v1379_v26 = vadd.f32 %v1366_v52, %v1341_v49 }
 0x6b2   :  { %v1385_v60 = vmax.f32 %v1378_v53, 0.0 }
 0x6b3   :  { %v1386_v63 = vmax.f32 %v1379_v26, 0.0  ;;  %v1360_v57 = vpop.permute.xlu1 %1359  ;;  %v1358_v58 = vpop.permute.xlu0 %1357 }
 0x6b4   :  { %v1367_v12 = vsel %vm1365_vm11, %v1356_v50, %v1358_v58  ;;  %v1368_v59 = vsel %vm1365_vm11, %v1358_v58, %v1360_v57  ;;  %1399 = vrot.lane.b32.xlu0 %v1385_v60, %s1617_s27 }
 0x6b5   :  { %v1380_v54 = vadd.f32 %v1367_v12, %v1342_v55  ;;  %v1381_v16 = vadd.f32 %v1368_v59, %v1343_v11  ;;  %1401 = vrot.lane.b32.xlu1 %v1386_v63, %s1617_s27 }
 0x6b7   :  { %v1387_v0 = vmax.f32 %v1380_v54, 0.0  ;;  %v1388_v56 = vmax.f32 %v1381_v16, 0.0  ;;  %v1364_v18 = vpop.permute.xlu1 %1363  ;;  %v1362_v20 = vpop.permute.xlu0 %1361 }
 0x6b8   :  { %v1369_v44 = vsel %vm1365_vm11, %v1360_v57, %v1362_v20  ;;  %v1370_v7 = vsel %vm1365_vm11, %v1362_v20, %v1364_v18  ;;  %v1384_v1 = vadd.f32 %v1364_v18, %v1346_v6 }
 0x6b9   :  { %v1382_v47 = vadd.f32 %v1369_v44, %v1344_v61  ;;  %v1383_v10 = vadd.f32 %v1370_v7, %v1345_v8  ;;  %1405 = vrot.lane.b32.xlu1 %v1388_v56, %s1617_s27  ;;  %1403 = vrot.lane.b32.xlu0 %v1387_v0, %s1617_s27 }
 0x6ba   :  { %v1391_v21 = vmax.f32 %v1384_v1, 0.0 }
 0x6bb   :  { %v1389_v4 = vmax.f32 %v1382_v47, 0.0  ;;  %v1390_v17 = vmax.f32 %v1383_v10, 0.0 }
 0x6bd   :  { %1409 = vrot.lane.b32.xlu1 %v1390_v17, %s1617_s27  ;;  %1407 = vrot.lane.b32.xlu0 %v1389_v4, %s1617_s27 }
 0x6c1   :  { %1411 = vrot.lane.b32.xlu0 %v1391_v21, %s1617_s27 }
 0x726   :  { %v1400_v27 = vpop.permute.xlu0 %1399 }
 0x727   :  { %v1402_v23 = vpop.permute.xlu1 %1401 }
 0x728   :  { %v1414_v24 = vsel %vm322_vm8, %v1400_v27, %v1402_v23 }
 0x729   :  { %1426 = vst [vmem:[#allocation7] sm:$0xff] %v1414_v24 }
 0x72b   :  { %v1406_v2 = vpop.permute.xlu1 %1405  ;;  %v1404_v22 = vpop.permute.xlu0 %1403 }
 0x72c   :  { %v1415_v25 = vsel %vm322_vm8, %v1402_v23, %v1404_v22  ;;  %v1416_v29 = vsel %vm322_vm8, %v1404_v22, %v1406_v2 }
 0x72d   :  { %1427 = vst [vmem:[#allocation7 + $0x8] sm:$0xff] %v1415_v25  ;;  %1428 = vst [vmem:[#allocation7 + $0x10] sm:$0xff] %v1416_v29 }
 0x72f   :  { %v1410_v30 = vpop.permute.xlu1 %1409  ;;  %v1408_v32 = vpop.permute.xlu0 %1407 }
 0x730   :  { %v1417_v33 = vsel %vm322_vm8, %v1406_v2, %v1408_v32  ;;  %v1418_v3 = vsel %vm322_vm8, %v1408_v32, %v1410_v30 }
 0x731   :  { %1429 = vst [vmem:[#allocation7 + $0x18] sm:$0xff] %v1417_v33  ;;  %1430 = vst [vmem:[#allocation7 + $0x20] sm:$0xff] %v1418_v3 }
 0x733   :  { %v1412_v34 = vpop.permute.xlu0 %1411 }
 0x734   :  { %v1419_v35 = vsel %vm322_vm8, %v1410_v30, %v1412_v34 }
 0x735   :  { %1431 = vst [vmem:[#allocation7 + $0x28] sm:$0xff] %v1419_v35 }
 0x736   :  { %1593 = shalt.err (!%p1590_p12)
}
 0x737   :  { %s1594_s21 = scalar_lea.hbm %s2333_s9, 768 }
 0x738   :  { %p1595_p13 = scmp.ne.s32.totalorder %s2333_s9, %s1594_s21  ;;  %p1598_p0 = scmp.lt.u32.totalorder %s1594_s21, %s2333_s9 }
 0x73a   :  { %p1600_p1 = pnand %p1598_p0, %p1595_p13 }
 0x73c   :  { %1603 = shalt.err (!%p1600_p1)
}
 0x73d   :  { %1441 = dma.vmem_to_hbm [thread:$0]  %s1439_s17, 768, %s2333_s9, [#allocation6]  }
 0x73e   :  { %1606 = dma.done.wait [#allocation6], 768  }
 0x73f   :  { %1607 = vsyncadd [#allocation6], 4294966528 }
 0x740   :  { %1445 = vsyncpa [#allocation5], 1 }
 0x741   :  { %1446 = vsyncpa [#allocation6], 1 }

</bundles_post_ra>
